<compile_context>
chip_gen: v5e
topology: v5e:2x2
jax: 0.10.0
libtpu: 0.0.40
codegen_flags: <defaults>
</compile_context>

<pallas_src>
import jax
import jax.numpy as jnp
from jax.experimental import pallas as pl
from jax.experimental.pallas import tpu as pltpu

# ---------------- config (small, BERT-like) ----------------
B = 2            # batch
S = 8            # sequence length
H = 128          # hidden size       (bert-base uses 768)
N_HEADS = 4
D = H // N_HEADS
I = 512          # intermediate size (bert-base uses 3072)
N_LAYERS = 2
VOCAB = 100
MAX_POS = 16
N_CLASSES = 10
C_PAD = 128      # lane-dense padded classifier width
LN_EPS = 1e-12
ATTN_SCALE = 1.0 / (D ** 0.5)


def _layernorm(x, g, b):
    mu = jnp.mean(x, axis=-1, keepdims=True)
    var = jnp.mean(jnp.square(x - mu), axis=-1, keepdims=True)
    return (x - mu) * jax.lax.rsqrt(var + LN_EPS) * g + b


# ---------------- per-layer kernel (grid over layers) ----------------
def bert_layer_kernel(emb_ref, eg_ref, eb_ref,
                      wqkv_ref, bqkv_ref, wo_ref, bo_ref, ln1g_ref, ln1b_ref,
                      w1_ref, b1_ref, w2_ref, b2_ref, ln2g_ref, ln2b_ref,
                      clsw_ref, clsb_ref, o_ref, h_ref):
    # ---- first layer: embeddings -> LayerNorm (no residual) ----
    @pl.when(pl.program_id(0) == 0)
    def _():
        h_ref[...] = _layernorm(emb_ref[...], eg_ref[...], eb_ref[...])

    h = h_ref[...]                                       # [B*S, H] f32 (carried)
    h_bf = h.astype(jnp.bfloat16)

    # ---- fused QKV projection (1/sqrt(D) already folded into Q weights) ----
    qkv = jnp.dot(h_bf, wqkv_ref[...],
                  preferred_element_type=jnp.float32) + bqkv_ref[...]   # [B*S, 3H]

    # heads -> einsum batch dim: [B*N_HEADS, S, D]
    def to_heads(x2d):                                   # [B*S, H] -> [B*NH, S, D]
        parts = [x2d[:, hh * D:(hh + 1) * D].reshape(B, 1, S, D)
                 for hh in range(N_HEADS)]
        return jnp.concatenate(parts, axis=1).reshape(B * N_HEADS, S, D)

    q = to_heads(qkv[:, 0:H]).astype(jnp.bfloat16)
    k = to_heads(qkv[:, H:2 * H]).astype(jnp.bfloat16)
    v = to_heads(qkv[:, 2 * H:3 * H]).astype(jnp.bfloat16)

    # ---- batched multi-head attention (bf16 MXU, f32 accumulate) ----
    s = jnp.einsum('bqd,bkd->bqk', q, k,
                   preferred_element_type=jnp.float32)   # [B*NH, S, S]
    s = s - jnp.max(s, axis=-1, keepdims=True)
    p = jnp.exp(s)
    p = p * pl.reciprocal(jnp.sum(p, axis=-1, keepdims=True), approx=True)
    ctx = jnp.einsum('bqk,bkd->bqd', p.astype(jnp.bfloat16), v,
                     preferred_element_type=jnp.float32)  # [B*NH, S, D]

    # heads back onto lanes and ONE output projection (K = H = 128)
    ctx4 = ctx.reshape(B, N_HEADS, S, D)
    ctx_full = jnp.concatenate(
        [ctx4[:, hh].reshape(B * S, D) for hh in range(N_HEADS)], axis=-1)  # [B*S, H]
    attn = jnp.dot(ctx_full.astype(jnp.bfloat16), wo_ref[...],
                   preferred_element_type=jnp.float32) + bo_ref[...]

    h1 = _layernorm(attn + h, ln1g_ref[...], ln1b_ref[...])

    # ---- feed-forward ----
    ffn = jnp.dot(h1.astype(jnp.bfloat16), w1_ref[...],
                  preferred_element_type=jnp.float32) + b1_ref[...]       # [B*S, I]
    ffn = jax.nn.gelu(ffn, approximate=True)
    ffn = jnp.dot(ffn.astype(jnp.bfloat16), w2_ref[...],
                  preferred_element_type=jnp.float32) + b2_ref[...]       # [B*S, H]
    h2 = _layernorm(ffn + h1, ln2g_ref[...], ln2b_ref[...])
    h_ref[...] = h2                                       # carry to next layer

    # ---- last layer: dropout(identity) -> Linear -> sum over seq ----
    # sum_s (x @ W + b) = (sum_s x) @ W + S * b   (lane-dense padded output)
    @pl.when(pl.program_id(0) == pl.num_programs(0) - 1)
    def _():
        hs = jnp.sum(h2.reshape(B, S, H), axis=1)         # [B, H]
        o_ref[...] = jnp.dot(hs.astype(jnp.bfloat16), clsw_ref[...],
                             preferred_element_type=jnp.float32) \
                     + float(S) * clsb_ref[...]


# ---------------- parameter init (deterministic, synthetic) ----------------
def init_params(key):
    def normal(k, shape, dtype=jnp.float32):
        return (0.02 * jax.random.normal(k, shape, dtype=jnp.float32)).astype(dtype)

    keys = iter(jax.random.split(key, 3 + 4 * N_LAYERS + 1))
    p = {
        "word_emb": normal(next(keys), (VOCAB, H)),
        "pos_emb": normal(next(keys), (MAX_POS, H)),
        "type_emb": normal(next(keys), (2, H)),
        "emb_ln_g": jnp.ones((1, H), jnp.float32),
        "emb_ln_b": jnp.zeros((1, H), jnp.float32),
    }

    wqkv, bqkv, wo, bo = [], [], [], []
    ln1g, ln1b, w1, b1, w2, b2, ln2g, ln2b = [], [], [], [], [], [], [], []
    for _ in range(N_LAYERS):
        wqkv_f32 = 0.02 * jax.random.normal(next(keys), (H, 3 * H), jnp.float32)
        bqkv_f32 = jnp.zeros((1, 3 * H), jnp.float32)
        # fold attention scale 1/sqrt(D) into the Q columns (exact, host-side)
        scale_cols = jnp.concatenate(
            [jnp.full((3 * H,), ATTN_SCALE).at[H:].set(1.0)]).reshape(1, 3 * H)
        wqkv.append((wqkv_f32 * scale_cols).astype(jnp.bfloat16))
        bqkv.append(bqkv_f32 * scale_cols)

        wo.append(normal(next(keys), (H, H), jnp.bfloat16))
        bo.append(jnp.zeros((1, H), jnp.float32))
        ln1g.append(jnp.ones((1, H), jnp.float32))
        ln1b.append(jnp.zeros((1, H), jnp.float32))
        w1.append(normal(next(keys), (H, I), jnp.bfloat16))
        b1.append(jnp.zeros((1, I), jnp.float32))
        w2.append(normal(next(keys), (I, H), jnp.bfloat16))
        b2.append(jnp.zeros((1, H), jnp.float32))
        ln2g.append(jnp.ones((1, H), jnp.float32))
        ln2b.append(jnp.zeros((1, H), jnp.float32))

    p.update(
        wqkv=jnp.stack(wqkv), bqkv=jnp.stack(bqkv),
        wo=jnp.stack(wo), bo=jnp.stack(bo),
        ln1_g=jnp.stack(ln1g), ln1_b=jnp.stack(ln1b),
        w1=jnp.stack(w1), b1=jnp.stack(b1),
        w2=jnp.stack(w2), b2=jnp.stack(b2),
        ln2_g=jnp.stack(ln2g), ln2_b=jnp.stack(ln2b),
    )

    cls_w = normal(next(keys), (H, N_CLASSES))
    cls_w_pad = jnp.zeros((H, C_PAD), jnp.bfloat16)
    cls_w_pad = cls_w_pad.at[:, :N_CLASSES].set(cls_w.astype(jnp.bfloat16))
    p["cls_w_pad"] = cls_w_pad
    p["cls_b_pad"] = jnp.zeros((1, C_PAD), jnp.float32)
    return p


# ---------------- forward pass (BERTClass.forward) ----------------
@jax.jit
def bert_class_forward(params, ids):
    # embedding gather / add is host-level glue (tiny); everything else is one
    # pallas_call with a layer grid.
    word = jnp.take(params["word_emb"], ids, axis=0)              # [B, S, H]
    pos = params["pos_emb"][:S][None, :, :]                       # [1, S, H]
    ttype = params["type_emb"][0][None, None, :]                  # [1, 1, H]
    emb = (word + pos + ttype).reshape(B * S, H).astype(jnp.float32)

    const2 = lambda l: (0, 0)        # resident (non-layer) operands
    layer3 = lambda l: (l, 0, 0)     # layer-indexed stacked weights

    grid_spec = pltpu.PrefetchScalarGridSpec(
        num_scalar_prefetch=0,
        grid=(N_LAYERS,),
        in_specs=[
            pl.BlockSpec((B * S, H), const2),              # emb
            pl.BlockSpec((1, H), const2),                  # emb_ln_g
            pl.BlockSpec((1, H), const2),                  # emb_ln_b
            pl.BlockSpec((None, H, 3 * H), layer3),        # wqkv  [L,H,3H]
            pl.BlockSpec((None, 1, 3 * H), layer3),        # bqkv
            pl.BlockSpec((None, H, H), layer3),            # wo
            pl.BlockSpec((None, 1, H), layer3),            # bo
            pl.BlockSpec((None, 1, H), layer3),            # ln1_g
            pl.BlockSpec((None, 1, H), layer3),            # ln1_b
            pl.BlockSpec((None, H, I), layer3),            # w1
            pl.BlockSpec((None, 1, I), layer3),            # b1
            pl.BlockSpec((None, I, H), layer3),            # w2
            pl.BlockSpec((None, 1, H), layer3),            # b2
            pl.BlockSpec((None, 1, H), layer3),            # ln2_g
            pl.BlockSpec((None, 1, H), layer3),            # ln2_b
            pl.BlockSpec((H, C_PAD), const2),              # cls_w_pad
            pl.BlockSpec((1, C_PAD), const2),              # cls_b_pad
        ],
        out_specs=pl.BlockSpec((B, C_PAD), const2),
        scratch_shapes=[pltpu.VMEM((B * S, H), jnp.float32)],   # carried activations
    )

    out_pad = pl.pallas_call(
        bert_layer_kernel,
        out_shape=jax.ShapeDtypeStruct((B, C_PAD), jnp.float32),
        grid_spec=grid_spec,
        compiler_params=pltpu.CompilerParams(
            dimension_semantics=("arbitrary",),
            # ~2x one layer's weights + activations live at a time; 48 MiB
            # leaves headroom even at BERT-base sizes and fits v7x's 64 MiB.
            vmem_limit_bytes=48 * 1024 * 1024,
        ),
    )(emb,
      params["emb_ln_g"], params["emb_ln_b"],
      params["wqkv"], params["bqkv"], params["wo"], params["bo"],
      params["ln1_g"], params["ln1_b"],
      params["w1"], params["b1"], params["w2"], params["b2"],
      params["ln2_g"], params["ln2_b"],
      params["cls_w_pad"], params["cls_b_pad"])

    return out_pad[:, :N_CLASSES]                                 # [B, 10]


if __name__ == "__main__":
    key = jax.random.PRNGKey(0)
    k_param, k_ids = jax.random.split(key)
    params = init_params(k_param)
    ids = jax.random.randint(k_ids, (B, S), 0, VOCAB, dtype=jnp.int32)

    out = bert_class_forward(params, ids)
    out = jax.block_until_ready(out)
    assert out.shape == (B, N_CLASSES) and out.dtype == jnp.float32
    assert bool(jnp.all(jnp.isfinite(out)))
    print("KERNEL_OK")
</pallas_src>

<mosaic_0001>
module attributes {stable_mosaic.version = 11 : i64} {
  func.func @bert_layer_kernel(%arg0: i32, %arg1: memref<16x128xf32, #tpu.memory_space<vmem>>, %arg2: memref<1x128xf32, #tpu.memory_space<vmem>>, %arg3: memref<1x128xf32, #tpu.memory_space<vmem>>, %arg4: memref<1x128x384xbf16, #tpu.memory_space<vmem>>, %arg5: memref<1x1x384xf32, #tpu.memory_space<vmem>>, %arg6: memref<1x128x128xbf16, #tpu.memory_space<vmem>>, %arg7: memref<1x1x128xf32, #tpu.memory_space<vmem>>, %arg8: memref<1x1x128xf32, #tpu.memory_space<vmem>>, %arg9: memref<1x1x128xf32, #tpu.memory_space<vmem>>, %arg10: memref<1x128x512xbf16, #tpu.memory_space<vmem>>, %arg11: memref<1x1x512xf32, #tpu.memory_space<vmem>>, %arg12: memref<1x512x128xbf16, #tpu.memory_space<vmem>>, %arg13: memref<1x1x128xf32, #tpu.memory_space<vmem>>, %arg14: memref<1x1x128xf32, #tpu.memory_space<vmem>>, %arg15: memref<1x1x128xf32, #tpu.memory_space<vmem>>, %arg16: memref<128x128xbf16, #tpu.memory_space<vmem>>, %arg17: memref<1x128xf32, #tpu.memory_space<vmem>>, %arg18: memref<2x128xf32, #tpu.memory_space<vmem>>, %arg19: memref<16x128xf32, #tpu.memory_space<vmem>>) attributes {dimension_semantics = [#tpu.dimension_semantics<arbitrary>], iteration_bounds = array<i64: 2>, scalar_prefetch = 0 : i64, scratch_operands = 1 : i64, tpu.core_type = #tpu.core_type<tc>, window_params = [{pipeline_mode = #tpu.pipeline_mode<synchronous>, transform_indices = @transform_0, window_bounds = array<i64: 16, 128>}, {pipeline_mode = #tpu.pipeline_mode<synchronous>, transform_indices = @transform_1, window_bounds = array<i64: 1, 128>}, {pipeline_mode = #tpu.pipeline_mode<synchronous>, transform_indices = @transform_2, window_bounds = array<i64: 1, 128>}, {transform_indices = @transform_3, window_bounds = array<i64: 1, 128, 384>}, {transform_indices = @transform_4, window_bounds = array<i64: 1, 1, 384>}, {transform_indices = @transform_5, window_bounds = array<i64: 1, 128, 128>}, {transform_indices = @transform_6, window_bounds = array<i64: 1, 1, 128>}, {transform_indices = @transform_7, window_bounds = array<i64: 1, 1, 128>}, {transform_indices = @transform_8, window_bounds = array<i64: 1, 1, 128>}, {transform_indices = @transform_9, window_bounds = array<i64: 1, 128, 512>}, {transform_indices = @transform_10, window_bounds = array<i64: 1, 1, 512>}, {transform_indices = @transform_11, window_bounds = array<i64: 1, 512, 128>}, {transform_indices = @transform_12, window_bounds = array<i64: 1, 1, 128>}, {transform_indices = @transform_13, window_bounds = array<i64: 1, 1, 128>}, {transform_indices = @transform_14, window_bounds = array<i64: 1, 1, 128>}, {pipeline_mode = #tpu.pipeline_mode<synchronous>, transform_indices = @transform_15, window_bounds = array<i64: 128, 128>}, {pipeline_mode = #tpu.pipeline_mode<synchronous>, transform_indices = @transform_16, window_bounds = array<i64: 1, 128>}, {pipeline_mode = #tpu.pipeline_mode<synchronous>, transform_indices = @transform_17, window_bounds = array<i64: 2, 128>}]} {
    %c0_i32 = arith.constant 0 : i32
    %0 = arith.cmpi eq, %arg0, %c0_i32 : i32
    %1 = arith.extui %0 : i1 to i32
    %c0_i32_0 = arith.constant 0 : i32
    %2 = arith.cmpi ne, %1, %c0_i32_0 : i32
    scf.if %2 {
      %c0_62 = arith.constant 0 : index
      %c0_63 = arith.constant 0 : index
      %170 = vector.load %arg1[%c0_62, %c0_63] : memref<16x128xf32, #tpu.memory_space<vmem>>, vector<16x128xf32>
      %c0_64 = arith.constant 0 : index
      %c0_65 = arith.constant 0 : index
      %171 = vector.load %arg2[%c0_64, %c0_65] : memref<1x128xf32, #tpu.memory_space<vmem>>, vector<1x128xf32>
      %c0_66 = arith.constant 0 : index
      %c0_67 = arith.constant 0 : index
      %172 = vector.load %arg3[%c0_66, %c0_67] : memref<1x128xf32, #tpu.memory_space<vmem>>, vector<1x128xf32>
      %cst_68 = arith.constant dense<0.000000e+00> : vector<16xf32>
      %173 = vector.multi_reduction <add>, %170, %cst_68 [1] : vector<16x128xf32> to vector<16xf32>
      %174 = vector.shape_cast %173 : vector<16xf32> to vector<16x1xf32>
      %cst_69 = arith.constant 1.280000e+02 : f32
      %175 = vector.broadcast %cst_69 : f32 to vector<16x1xf32>
      %176 = arith.divf %174, %175 : vector<16x1xf32>
      %177 = vector.broadcast %176 : vector<16x1xf32> to vector<16x128xf32>
      %178 = arith.subf %170, %177 : vector<16x128xf32>
      %179 = arith.mulf %178, %178 : vector<16x128xf32>
      %cst_70 = arith.constant dense<0.000000e+00> : vector<16xf32>
      %180 = vector.multi_reduction <add>, %179, %cst_70 [1] : vector<16x128xf32> to vector<16xf32>
      %181 = vector.shape_cast %180 : vector<16xf32> to vector<16x1xf32>
      %cst_71 = arith.constant 1.280000e+02 : f32
      %182 = vector.broadcast %cst_71 : f32 to vector<16x1xf32>
      %183 = arith.divf %181, %182 : vector<16x1xf32>
      %184 = vector.broadcast %176 : vector<16x1xf32> to vector<16x128xf32>
      %185 = arith.subf %170, %184 : vector<16x128xf32>
      %cst_72 = arith.constant 9.99999996E-13 : f32
      %186 = vector.broadcast %cst_72 : f32 to vector<16x1xf32>
      %187 = arith.addf %183, %186 : vector<16x1xf32>
      %188 = math.rsqrt %187 : vector<16x1xf32>
      %189 = vector.broadcast %188 : vector<16x1xf32> to vector<16x128xf32>
      %190 = arith.mulf %185, %189 : vector<16x128xf32>
      %191 = vector.broadcast %171 : vector<1x128xf32> to vector<16x128xf32>
      %192 = arith.mulf %190, %191 : vector<16x128xf32>
      %193 = vector.broadcast %172 : vector<1x128xf32> to vector<16x128xf32>
      %194 = arith.addf %192, %193 : vector<16x128xf32>
      %c0_73 = arith.constant 0 : index
      %c0_74 = arith.constant 0 : index
      %195 = vector.load %arg19[%c0_73, %c0_74] : memref<16x128xf32, #tpu.memory_space<vmem>>, vector<16x128xf32>
      tpu.vector_store %arg19[%c0_73, %c0_74], %194 {strides = array<i32>} : memref<16x128xf32, #tpu.memory_space<vmem>>, vector<16x128xf32>,
    } else {
    }
    %c0 = arith.constant 0 : index
    %c0_1 = arith.constant 0 : index
    %3 = vector.load %arg19[%c0, %c0_1] : memref<16x128xf32, #tpu.memory_space<vmem>>, vector<16x128xf32>
    %4 = arith.truncf %3 : vector<16x128xf32> to vector<16x128xbf16>
    %c0_2 = arith.constant 0 : index
    %c0_3 = arith.constant 0 : index
    %c0_4 = arith.constant 0 : index
    %5 = vector.load %arg4[%c0_2, %c0_3, %c0_4] : memref<1x128x384xbf16, #tpu.memory_space<vmem>>, vector<1x128x384xbf16>
    %6 = vector.shape_cast %5 : vector<1x128x384xbf16> to vector<128x384xbf16>
    %cst = arith.constant dense<0.000000e+00> : vector<16x384xf32>
    %7 = tpu.matmul %4, %6, %cst {dimension_numbers = #tpu.dot_dimension_numbers<[1], [0], [0], [1], [0, 0, 1, 1], [], []>} : vector<16x128xbf16>, vector<128x384xbf16>, vector<16x384xf32> -> vector<16x384xf32>
    %c0_5 = arith.constant 0 : index
    %c0_6 = arith.constant 0 : index
    %c0_7 = arith.constant 0 : index
    %8 = vector.load %arg5[%c0_5, %c0_6, %c0_7] : memref<1x1x384xf32, #tpu.memory_space<vmem>>, vector<1x1x384xf32>
    %9 = vector.shape_cast %8 : vector<1x1x384xf32> to vector<1x384xf32>
    %10 = vector.broadcast %9 : vector<1x384xf32> to vector<16x384xf32>
    %11 = arith.addf %7, %10 : vector<16x384xf32>
    %12 = vector.extract_strided_slice %11 {offsets = [0, 0], sizes = [16, 128], strides = [1, 1]} : vector<16x384xf32> to vector<16x128xf32>
    %13 = vector.extract_strided_slice %12 {offsets = [0, 0], sizes = [16, 32], strides = [1, 1]} : vector<16x128xf32> to vector<16x32xf32>
    %14 = vector.shape_cast %13 : vector<16x32xf32> to vector<2x1x8x32xf32>
    %15 = vector.extract_strided_slice %12 {offsets = [0, 32], sizes = [16, 32], strides = [1, 1]} : vector<16x128xf32> to vector<16x32xf32>
    %16 = vector.shape_cast %15 : vector<16x32xf32> to vector<2x1x8x32xf32>
    %17 = vector.extract_strided_slice %12 {offsets = [0, 64], sizes = [16, 32], strides = [1, 1]} : vector<16x128xf32> to vector<16x32xf32>
    %18 = vector.shape_cast %17 : vector<16x32xf32> to vector<2x1x8x32xf32>
    %19 = vector.extract_strided_slice %12 {offsets = [0, 96], sizes = [16, 32], strides = [1, 1]} : vector<16x128xf32> to vector<16x32xf32>
    %20 = vector.shape_cast %19 : vector<16x32xf32> to vector<2x1x8x32xf32>
    %21 = tpu.concatenate %14, %16, %18, %20 in 1 : vector<2x1x8x32xf32>, vector<2x1x8x32xf32>, vector<2x1x8x32xf32>, vector<2x1x8x32xf32> -> vector<2x4x8x32xf32>
    %22 = vector.shape_cast %21 : vector<2x4x8x32xf32> to vector<8x8x32xf32>
    %23 = arith.truncf %22 : vector<8x8x32xf32> to vector<8x8x32xbf16>
    %24 = vector.extract_strided_slice %11 {offsets = [0, 128], sizes = [16, 128], strides = [1, 1]} : vector<16x384xf32> to vector<16x128xf32>
    %25 = vector.extract_strided_slice %24 {offsets = [0, 0], sizes = [16, 32], strides = [1, 1]} : vector<16x128xf32> to vector<16x32xf32>
    %26 = vector.shape_cast %25 : vector<16x32xf32> to vector<2x1x8x32xf32>
    %27 = vector.extract_strided_slice %24 {offsets = [0, 32], sizes = [16, 32], strides = [1, 1]} : vector<16x128xf32> to vector<16x32xf32>
    %28 = vector.shape_cast %27 : vector<16x32xf32> to vector<2x1x8x32xf32>
    %29 = vector.extract_strided_slice %24 {offsets = [0, 64], sizes = [16, 32], strides = [1, 1]} : vector<16x128xf32> to vector<16x32xf32>
    %30 = vector.shape_cast %29 : vector<16x32xf32> to vector<2x1x8x32xf32>
    %31 = vector.extract_strided_slice %24 {offsets = [0, 96], sizes = [16, 32], strides = [1, 1]} : vector<16x128xf32> to vector<16x32xf32>
    %32 = vector.shape_cast %31 : vector<16x32xf32> to vector<2x1x8x32xf32>
    %33 = tpu.concatenate %26, %28, %30, %32 in 1 : vector<2x1x8x32xf32>, vector<2x1x8x32xf32>, vector<2x1x8x32xf32>, vector<2x1x8x32xf32> -> vector<2x4x8x32xf32>
    %34 = vector.shape_cast %33 : vector<2x4x8x32xf32> to vector<8x8x32xf32>
    %35 = arith.truncf %34 : vector<8x8x32xf32> to vector<8x8x32xbf16>
    %36 = vector.extract_strided_slice %11 {offsets = [0, 256], sizes = [16, 128], strides = [1, 1]} : vector<16x384xf32> to vector<16x128xf32>
    %37 = vector.extract_strided_slice %36 {offsets = [0, 0], sizes = [16, 32], strides = [1, 1]} : vector<16x128xf32> to vector<16x32xf32>
    %38 = vector.shape_cast %37 : vector<16x32xf32> to vector<2x1x8x32xf32>
    %39 = vector.extract_strided_slice %36 {offsets = [0, 32], sizes = [16, 32], strides = [1, 1]} : vector<16x128xf32> to vector<16x32xf32>
    %40 = vector.shape_cast %39 : vector<16x32xf32> to vector<2x1x8x32xf32>
    %41 = vector.extract_strided_slice %36 {offsets = [0, 64], sizes = [16, 32], strides = [1, 1]} : vector<16x128xf32> to vector<16x32xf32>
    %42 = vector.shape_cast %41 : vector<16x32xf32> to vector<2x1x8x32xf32>
    %43 = vector.extract_strided_slice %36 {offsets = [0, 96], sizes = [16, 32], strides = [1, 1]} : vector<16x128xf32> to vector<16x32xf32>
    %44 = vector.shape_cast %43 : vector<16x32xf32> to vector<2x1x8x32xf32>
    %45 = tpu.concatenate %38, %40, %42, %44 in 1 : vector<2x1x8x32xf32>, vector<2x1x8x32xf32>, vector<2x1x8x32xf32>, vector<2x1x8x32xf32> -> vector<2x4x8x32xf32>
    %46 = vector.shape_cast %45 : vector<2x4x8x32xf32> to vector<8x8x32xf32>
    %47 = arith.truncf %46 : vector<8x8x32xf32> to vector<8x8x32xbf16>
    "tpu.trace_start"() <{level = 10 : i32, message = "bqd,bkd->bqk"}> : () -> ()
    %cst_8 = arith.constant dense<0.000000e+00> : vector<8x8x8xf32>
    %48 = tpu.matmul %23, %35, %cst_8 {dimension_numbers = #tpu.dot_dimension_numbers<[2], [2], [1], [1], [0, 0, 0, 1, 1, 1], [0], [0]>} : vector<8x8x32xbf16>, vector<8x8x32xbf16>, vector<8x8x8xf32> -> vector<8x8x8xf32>
    "tpu.trace_stop"() : () -> ()
    %cst_9 = arith.constant dense<0xFF800000> : vector<8x8xf32>
    %49 = vector.multi_reduction <maximumf>, %48, %cst_9 [2] : vector<8x8x8xf32> to vector<8x8xf32>
    %50 = vector.shape_cast %49 : vector<8x8xf32> to vector<8x8x1xf32>
    %51 = vector.broadcast %50 : vector<8x8x1xf32> to vector<8x8x8xf32>
    %52 = arith.subf %48, %51 : vector<8x8x8xf32>
    %53 = math.exp %52 : vector<8x8x8xf32>
    %cst_10 = arith.constant dense<0.000000e+00> : vector<8x8xf32>
    %54 = vector.multi_reduction <add>, %53, %cst_10 [2] : vector<8x8x8xf32> to vector<8x8xf32>
    %55 = vector.shape_cast %54 : vector<8x8xf32> to vector<8x8x1xf32>
    %56 = tpu.reciprocal %55 {approx = true} : vector<8x8x1xf32> -> vector<8x8x1xf32>
    %57 = vector.broadcast %56 : vector<8x8x1xf32> to vector<8x8x8xf32>
    %58 = arith.mulf %53, %57 : vector<8x8x8xf32>
    %59 = arith.truncf %58 : vector<8x8x8xf32> to vector<8x8x8xbf16>
    "tpu.trace_start"() <{level = 10 : i32, message = "bqk,bkd->bqd"}> : () -> ()
    %cst_11 = arith.constant dense<0.000000e+00> : vector<8x8x32xf32>
    %60 = tpu.matmul %59, %47, %cst_11 {dimension_numbers = #tpu.dot_dimension_numbers<[2], [1], [1], [2], [0, 0, 0, 1, 1, 2], [0], [0]>} : vector<8x8x8xbf16>, vector<8x8x32xbf16>, vector<8x8x32xf32> -> vector<8x8x32xf32>
    "tpu.trace_stop"() : () -> ()
    %61 = vector.shape_cast %60 : vector<8x8x32xf32> to vector<2x4x8x32xf32>
    %62 = vector.extract_strided_slice %61 {offsets = [0, 0, 0, 0], sizes = [2, 1, 8, 32], strides = [1, 1, 1, 1]} : vector<2x4x8x32xf32> to vector<2x1x8x32xf32>
    %63 = vector.shape_cast %62 : vector<2x1x8x32xf32> to vector<2x8x32xf32>
    %64 = vector.shape_cast %63 : vector<2x8x32xf32> to vector<16x32xf32>
    %65 = vector.extract_strided_slice %61 {offsets = [0, 1, 0, 0], sizes = [2, 1, 8, 32], strides = [1, 1, 1, 1]} : vector<2x4x8x32xf32> to vector<2x1x8x32xf32>
    %66 = vector.shape_cast %65 : vector<2x1x8x32xf32> to vector<2x8x32xf32>
    %67 = vector.shape_cast %66 : vector<2x8x32xf32> to vector<16x32xf32>
    %68 = vector.extract_strided_slice %61 {offsets = [0, 2, 0, 0], sizes = [2, 1, 8, 32], strides = [1, 1, 1, 1]} : vector<2x4x8x32xf32> to vector<2x1x8x32xf32>
    %69 = vector.shape_cast %68 : vector<2x1x8x32xf32> to vector<2x8x32xf32>
    %70 = vector.shape_cast %69 : vector<2x8x32xf32> to vector<16x32xf32>
    %71 = vector.extract_strided_slice %61 {offsets = [0, 3, 0, 0], sizes = [2, 1, 8, 32], strides = [1, 1, 1, 1]} : vector<2x4x8x32xf32> to vector<2x1x8x32xf32>
    %72 = vector.shape_cast %71 : vector<2x1x8x32xf32> to vector<2x8x32xf32>
    %73 = vector.shape_cast %72 : vector<2x8x32xf32> to vector<16x32xf32>
    %74 = tpu.concatenate %64, %67, %70, %73 in 1 : vector<16x32xf32>, vector<16x32xf32>, vector<16x32xf32>, vector<16x32xf32> -> vector<16x128xf32>
    %75 = arith.truncf %74 : vector<16x128xf32> to vector<16x128xbf16>
    %c0_12 = arith.constant 0 : index
    %c0_13 = arith.constant 0 : index
    %c0_14 = arith.constant 0 : index
    %76 = vector.load %arg6[%c0_12, %c0_13, %c0_14] : memref<1x128x128xbf16, #tpu.memory_space<vmem>>, vector<1x128x128xbf16>
    %77 = vector.shape_cast %76 : vector<1x128x128xbf16> to vector<128x128xbf16>
    %cst_15 = arith.constant dense<0.000000e+00> : vector<16x128xf32>
    %78 = tpu.matmul %75, %77, %cst_15 {dimension_numbers = #tpu.dot_dimension_numbers<[1], [0], [0], [1], [0, 0, 1, 1], [], []>} : vector<16x128xbf16>, vector<128x128xbf16>, vector<16x128xf32> -> vector<16x128xf32>
    %c0_16 = arith.constant 0 : index
    %c0_17 = arith.constant 0 : index
    %c0_18 = arith.constant 0 : index
    %79 = vector.load %arg7[%c0_16, %c0_17, %c0_18] : memref<1x1x128xf32, #tpu.memory_space<vmem>>, vector<1x1x128xf32>
    %80 = vector.shape_cast %79 : vector<1x1x128xf32> to vector<1x128xf32>
    %81 = vector.broadcast %80 : vector<1x128xf32> to vector<16x128xf32>
    %82 = arith.addf %78, %81 : vector<16x128xf32>
    %83 = arith.addf %82, %3 : vector<16x128xf32>
    %c0_19 = arith.constant 0 : index
    %c0_20 = arith.constant 0 : index
    %c0_21 = arith.constant 0 : index
    %84 = vector.load %arg8[%c0_19, %c0_20, %c0_21] : memref<1x1x128xf32, #tpu.memory_space<vmem>>, vector<1x1x128xf32>
    %85 = vector.shape_cast %84 : vector<1x1x128xf32> to vector<1x128xf32>
    %c0_22 = arith.constant 0 : index
    %c0_23 = arith.constant 0 : index
    %c0_24 = arith.constant 0 : index
    %86 = vector.load %arg9[%c0_22, %c0_23, %c0_24] : memref<1x1x128xf32, #tpu.memory_space<vmem>>, vector<1x1x128xf32>
    %87 = vector.shape_cast %86 : vector<1x1x128xf32> to vector<1x128xf32>
    %cst_25 = arith.constant dense<0.000000e+00> : vector<16xf32>
    %88 = vector.multi_reduction <add>, %83, %cst_25 [1] : vector<16x128xf32> to vector<16xf32>
    %89 = vector.shape_cast %88 : vector<16xf32> to vector<16x1xf32>
    %cst_26 = arith.constant 1.280000e+02 : f32
    %90 = vector.broadcast %cst_26 : f32 to vector<16x1xf32>
    %91 = arith.divf %89, %90 : vector<16x1xf32>
    %92 = vector.broadcast %91 : vector<16x1xf32> to vector<16x128xf32>
    %93 = arith.subf %83, %92 : vector<16x128xf32>
    %94 = arith.mulf %93, %93 : vector<16x128xf32>
    %cst_27 = arith.constant dense<0.000000e+00> : vector<16xf32>
    %95 = vector.multi_reduction <add>, %94, %cst_27 [1] : vector<16x128xf32> to vector<16xf32>
    %96 = vector.shape_cast %95 : vector<16xf32> to vector<16x1xf32>
    %cst_28 = arith.constant 1.280000e+02 : f32
    %97 = vector.broadcast %cst_28 : f32 to vector<16x1xf32>
    %98 = arith.divf %96, %97 : vector<16x1xf32>
    %99 = vector.broadcast %91 : vector<16x1xf32> to vector<16x128xf32>
    %100 = arith.subf %83, %99 : vector<16x128xf32>
    %cst_29 = arith.constant 9.99999996E-13 : f32
    %101 = vector.broadcast %cst_29 : f32 to vector<16x1xf32>
    %102 = arith.addf %98, %101 : vector<16x1xf32>
    %103 = math.rsqrt %102 : vector<16x1xf32>
    %104 = vector.broadcast %103 : vector<16x1xf32> to vector<16x128xf32>
    %105 = arith.mulf %100, %104 : vector<16x128xf32>
    %106 = vector.broadcast %85 : vector<1x128xf32> to vector<16x128xf32>
    %107 = arith.mulf %105, %106 : vector<16x128xf32>
    %108 = vector.broadcast %87 : vector<1x128xf32> to vector<16x128xf32>
    %109 = arith.addf %107, %108 : vector<16x128xf32>
    %110 = arith.truncf %109 : vector<16x128xf32> to vector<16x128xbf16>
    %c0_30 = arith.constant 0 : index
    %c0_31 = arith.constant 0 : index
    %c0_32 = arith.constant 0 : index
    %111 = vector.load %arg10[%c0_30, %c0_31, %c0_32] : memref<1x128x512xbf16, #tpu.memory_space<vmem>>, vector<1x128x512xbf16>
    %112 = vector.shape_cast %111 : vector<1x128x512xbf16> to vector<128x512xbf16>
    %cst_33 = arith.constant dense<0.000000e+00> : vector<16x512xf32>
    %113 = tpu.matmul %110, %112, %cst_33 {dimension_numbers = #tpu.dot_dimension_numbers<[1], [0], [0], [1], [0, 0, 1, 1], [], []>} : vector<16x128xbf16>, vector<128x512xbf16>, vector<16x512xf32> -> vector<16x512xf32>
    %c0_34 = arith.constant 0 : index
    %c0_35 = arith.constant 0 : index
    %c0_36 = arith.constant 0 : index
    %114 = vector.load %arg11[%c0_34, %c0_35, %c0_36] : memref<1x1x512xf32, #tpu.memory_space<vmem>>, vector<1x1x512xf32>
    %115 = vector.shape_cast %114 : vector<1x1x512xf32> to vector<1x512xf32>
    %116 = vector.broadcast %115 : vector<1x512xf32> to vector<16x512xf32>
    %117 = arith.addf %113, %116 : vector<16x512xf32>
    %118 = arith.mulf %117, %117 : vector<16x512xf32>
    %119 = arith.mulf %117, %118 : vector<16x512xf32>
    %cst_37 = arith.constant 4.471500e-02 : f32
    %120 = vector.broadcast %cst_37 : f32 to vector<16x512xf32>
    %121 = arith.mulf %120, %119 : vector<16x512xf32>
    %122 = arith.addf %117, %121 : vector<16x512xf32>
    %cst_38 = arith.constant 0.797884583 : f32
    %123 = vector.broadcast %cst_38 : f32 to vector<16x512xf32>
    %124 = arith.mulf %123, %122 : vector<16x512xf32>
    %125 = math.tanh %124 : vector<16x512xf32>
    %cst_39 = arith.constant 1.000000e+00 : f32
    %126 = vector.broadcast %cst_39 : f32 to vector<16x512xf32>
    %127 = arith.addf %126, %125 : vector<16x512xf32>
    %cst_40 = arith.constant 5.000000e-01 : f32
    %128 = vector.broadcast %cst_40 : f32 to vector<16x512xf32>
    %129 = arith.mulf %128, %127 : vector<16x512xf32>
    %130 = arith.mulf %117, %129 : vector<16x512xf32>
    %131 = arith.truncf %130 : vector<16x512xf32> to vector<16x512xbf16>
    %c0_41 = arith.constant 0 : index
    %c0_42 = arith.constant 0 : index
    %c0_43 = arith.constant 0 : index
    %132 = vector.load %arg12[%c0_41, %c0_42, %c0_43] : memref<1x512x128xbf16, #tpu.memory_space<vmem>>, vector<1x512x128xbf16>
    %133 = vector.shape_cast %132 : vector<1x512x128xbf16> to vector<512x128xbf16>
    %cst_44 = arith.constant dense<0.000000e+00> : vector<16x128xf32>
    %134 = tpu.matmul %131, %133, %cst_44 {dimension_numbers = #tpu.dot_dimension_numbers<[1], [0], [0], [1], [0, 0, 1, 1], [], []>} : vector<16x512xbf16>, vector<512x128xbf16>, vector<16x128xf32> -> vector<16x128xf32>
    %c0_45 = arith.constant 0 : index
    %c0_46 = arith.constant 0 : index
    %c0_47 = arith.constant 0 : index
    %135 = vector.load %arg13[%c0_45, %c0_46, %c0_47] : memref<1x1x128xf32, #tpu.memory_space<vmem>>, vector<1x1x128xf32>
    %136 = vector.shape_cast %135 : vector<1x1x128xf32> to vector<1x128xf32>
    %137 = vector.broadcast %136 : vector<1x128xf32> to vector<16x128xf32>
    %138 = arith.addf %134, %137 : vector<16x128xf32>
    %139 = arith.addf %138, %109 : vector<16x128xf32>
    %c0_48 = arith.constant 0 : index
    %c0_49 = arith.constant 0 : index
    %c0_50 = arith.constant 0 : index
    %140 = vector.load %arg14[%c0_48, %c0_49, %c0_50] : memref<1x1x128xf32, #tpu.memory_space<vmem>>, vector<1x1x128xf32>
    %141 = vector.shape_cast %140 : vector<1x1x128xf32> to vector<1x128xf32>
    %c0_51 = arith.constant 0 : index
    %c0_52 = arith.constant 0 : index
    %c0_53 = arith.constant 0 : index
    %142 = vector.load %arg15[%c0_51, %c0_52, %c0_53] : memref<1x1x128xf32, #tpu.memory_space<vmem>>, vector<1x1x128xf32>
    %143 = vector.shape_cast %142 : vector<1x1x128xf32> to vector<1x128xf32>
    %cst_54 = arith.constant dense<0.000000e+00> : vector<16xf32>
    %144 = vector.multi_reduction <add>, %139, %cst_54 [1] : vector<16x128xf32> to vector<16xf32>
    %145 = vector.shape_cast %144 : vector<16xf32> to vector<16x1xf32>
    %cst_55 = arith.constant 1.280000e+02 : f32
    %146 = vector.broadcast %cst_55 : f32 to vector<16x1xf32>
    %147 = arith.divf %145, %146 : vector<16x1xf32>
    %148 = vector.broadcast %147 : vector<16x1xf32> to vector<16x128xf32>
    %149 = arith.subf %139, %148 : vector<16x128xf32>
    %150 = arith.mulf %149, %149 : vector<16x128xf32>
    %cst_56 = arith.constant dense<0.000000e+00> : vector<16xf32>
    %151 = vector.multi_reduction <add>, %150, %cst_56 [1] : vector<16x128xf32> to vector<16xf32>
    %152 = vector.shape_cast %151 : vector<16xf32> to vector<16x1xf32>
    %cst_57 = arith.constant 1.280000e+02 : f32
    %153 = vector.broadcast %cst_57 : f32 to vector<16x1xf32>
    %154 = arith.divf %152, %153 : vector<16x1xf32>
    %155 = vector.broadcast %147 : vector<16x1xf32> to vector<16x128xf32>
    %156 = arith.subf %139, %155 : vector<16x128xf32>
    %cst_58 = arith.constant 9.99999996E-13 : f32
    %157 = vector.broadcast %cst_58 : f32 to vector<16x1xf32>
    %158 = arith.addf %154, %157 : vector<16x1xf32>
    %159 = math.rsqrt %158 : vector<16x1xf32>
    %160 = vector.broadcast %159 : vector<16x1xf32> to vector<16x128xf32>
    %161 = arith.mulf %156, %160 : vector<16x128xf32>
    %162 = vector.broadcast %141 : vector<1x128xf32> to vector<16x128xf32>
    %163 = arith.mulf %161, %162 : vector<16x128xf32>
    %164 = vector.broadcast %143 : vector<1x128xf32> to vector<16x128xf32>
    %165 = arith.addf %163, %164 : vector<16x128xf32>
    %c0_59 = arith.constant 0 : index
    %c0_60 = arith.constant 0 : index
    %166 = vector.load %arg19[%c0_59, %c0_60] : memref<16x128xf32, #tpu.memory_space<vmem>>, vector<16x128xf32>
    tpu.vector_store %arg19[%c0_59, %c0_60], %165 {strides = array<i32>} : memref<16x128xf32, #tpu.memory_space<vmem>>, vector<16x128xf32>,
    %c1_i32 = arith.constant 1 : i32
    %167 = arith.cmpi eq, %arg0, %c1_i32 : i32
    %168 = arith.extui %167 : i1 to i32
    %c0_i32_61 = arith.constant 0 : i32
    %169 = arith.cmpi ne, %168, %c0_i32_61 : i32
    scf.if %169 {
      %170 = vector.shape_cast %165 : vector<16x128xf32> to vector<2x8x128xf32>
      %cst_62 = arith.constant dense<0.000000e+00> : vector<2x128xf32>
      %171 = vector.multi_reduction <add>, %170, %cst_62 [1] : vector<2x8x128xf32> to vector<2x128xf32>
      %172 = arith.truncf %171 : vector<2x128xf32> to vector<2x128xbf16>
      %c0_63 = arith.constant 0 : index
      %c0_64 = arith.constant 0 : index
      %173 = vector.load %arg16[%c0_63, %c0_64] : memref<128x128xbf16, #tpu.memory_space<vmem>>, vector<128x128xbf16>
      %cst_65 = arith.constant dense<0.000000e+00> : vector<2x128xf32>
      %174 = tpu.matmul %172, %173, %cst_65 {dimension_numbers = #tpu.dot_dimension_numbers<[1], [0], [0], [1], [0, 0, 1, 1], [], []>} : vector<2x128xbf16>, vector<128x128xbf16>, vector<2x128xf32> -> vector<2x128xf32>
      %c0_66 = arith.constant 0 : index
      %c0_67 = arith.constant 0 : index
      %175 = vector.load %arg17[%c0_66, %c0_67] : memref<1x128xf32, #tpu.memory_space<vmem>>, vector<1x128xf32>
      %cst_68 = arith.constant 8.000000e+00 : f32
      %176 = vector.broadcast %cst_68 : f32 to vector<1x128xf32>
      %177 = arith.mulf %176, %175 : vector<1x128xf32>
      %178 = vector.broadcast %177 : vector<1x128xf32> to vector<2x128xf32>
      %179 = arith.addf %174, %178 : vector<2x128xf32>
      %c0_69 = arith.constant 0 : index
      %c0_70 = arith.constant 0 : index
      %180 = vector.load %arg18[%c0_69, %c0_70] : memref<2x128xf32, #tpu.memory_space<vmem>>, vector<2x128xf32>
      tpu.vector_store %arg18[%c0_69, %c0_70], %179 {strides = array<i32>} : memref<2x128xf32, #tpu.memory_space<vmem>>, vector<2x128xf32>,
    } else {
    }
    return
  }
  func.func @transform_0(%arg0: i32) -> (i32, i32) {
    %c0_i32 = arith.constant 0 : i32
    %c0_i32_0 = arith.constant 0 : i32
    %c0_i32_1 = arith.constant 0 : i32
    return %c0_i32, %c0_i32_0 : i32, i32
  }
  func.func @transform_1(%arg0: i32) -> (i32, i32) {
    %c0_i32 = arith.constant 0 : i32
    %c0_i32_0 = arith.constant 0 : i32
    %c0_i32_1 = arith.constant 0 : i32
    return %c0_i32, %c0_i32_0 : i32, i32
  }
  func.func @transform_2(%arg0: i32) -> (i32, i32) {
    %c0_i32 = arith.constant 0 : i32
    %c0_i32_0 = arith.constant 0 : i32
    %c0_i32_1 = arith.constant 0 : i32
    return %c0_i32, %c0_i32_0 : i32, i32
  }
  func.func @transform_3(%arg0: i32) -> (i32, i32, i32) {
    %c0_i32 = arith.constant 0 : i32
    %c0_i32_0 = arith.constant 0 : i32
    %c0_i32_1 = arith.constant 0 : i32
    return %arg0, %c0_i32, %c0_i32_0 : i32, i32, i32
  }
  func.func @transform_4(%arg0: i32) -> (i32, i32, i32) {
    %c0_i32 = arith.constant 0 : i32
    %c0_i32_0 = arith.constant 0 : i32
    %c0_i32_1 = arith.constant 0 : i32
    return %arg0, %c0_i32, %c0_i32_0 : i32, i32, i32
  }
  func.func @transform_5(%arg0: i32) -> (i32, i32, i32) {
    %c0_i32 = arith.constant 0 : i32
    %c0_i32_0 = arith.constant 0 : i32
    %c0_i32_1 = arith.constant 0 : i32
    return %arg0, %c0_i32, %c0_i32_0 : i32, i32, i32
  }
  func.func @transform_6(%arg0: i32) -> (i32, i32, i32) {
    %c0_i32 = arith.constant 0 : i32
    %c0_i32_0 = arith.constant 0 : i32
    %c0_i32_1 = arith.constant 0 : i32
    return %arg0, %c0_i32, %c0_i32_0 : i32, i32, i32
  }
  func.func @transform_7(%arg0: i32) -> (i32, i32, i32) {
    %c0_i32 = arith.constant 0 : i32
    %c0_i32_0 = arith.constant 0 : i32
    %c0_i32_1 = arith.constant 0 : i32
    return %arg0, %c0_i32, %c0_i32_0 : i32, i32, i32
  }
  func.func @transform_8(%arg0: i32) -> (i32, i32, i32) {
    %c0_i32 = arith.constant 0 : i32
    %c0_i32_0 = arith.constant 0 : i32
    %c0_i32_1 = arith.constant 0 : i32
    return %arg0, %c0_i32, %c0_i32_0 : i32, i32, i32
  }
  func.func @transform_9(%arg0: i32) -> (i32, i32, i32) {
    %c0_i32 = arith.constant 0 : i32
    %c0_i32_0 = arith.constant 0 : i32
    %c0_i32_1 = arith.constant 0 : i32
    return %arg0, %c0_i32, %c0_i32_0 : i32, i32, i32
  }
  func.func @transform_10(%arg0: i32) -> (i32, i32, i32) {
    %c0_i32 = arith.constant 0 : i32
    %c0_i32_0 = arith.constant 0 : i32
    %c0_i32_1 = arith.constant 0 : i32
    return %arg0, %c0_i32, %c0_i32_0 : i32, i32, i32
  }
  func.func @transform_11(%arg0: i32) -> (i32, i32, i32) {
    %c0_i32 = arith.constant 0 : i32
    %c0_i32_0 = arith.constant 0 : i32
    %c0_i32_1 = arith.constant 0 : i32
    return %arg0, %c0_i32, %c0_i32_0 : i32, i32, i32
  }
  func.func @transform_12(%arg0: i32) -> (i32, i32, i32) {
    %c0_i32 = arith.constant 0 : i32
    %c0_i32_0 = arith.constant 0 : i32
    %c0_i32_1 = arith.constant 0 : i32
    return %arg0, %c0_i32, %c0_i32_0 : i32, i32, i32
  }
  func.func @transform_13(%arg0: i32) -> (i32, i32, i32) {
    %c0_i32 = arith.constant 0 : i32
    %c0_i32_0 = arith.constant 0 : i32
    %c0_i32_1 = arith.constant 0 : i32
    return %arg0, %c0_i32, %c0_i32_0 : i32, i32, i32
  }
  func.func @transform_14(%arg0: i32) -> (i32, i32, i32) {
    %c0_i32 = arith.constant 0 : i32
    %c0_i32_0 = arith.constant 0 : i32
    %c0_i32_1 = arith.constant 0 : i32
    return %arg0, %c0_i32, %c0_i32_0 : i32, i32, i32
  }
  func.func @transform_15(%arg0: i32) -> (i32, i32) {
    %c0_i32 = arith.constant 0 : i32
    %c0_i32_0 = arith.constant 0 : i32
    %c0_i32_1 = arith.constant 0 : i32
    return %c0_i32, %c0_i32_0 : i32, i32
  }
  func.func @transform_16(%arg0: i32) -> (i32, i32) {
    %c0_i32 = arith.constant 0 : i32
    %c0_i32_0 = arith.constant 0 : i32
    %c0_i32_1 = arith.constant 0 : i32
    return %c0_i32, %c0_i32_0 : i32, i32
  }
  func.func @transform_17(%arg0: i32) -> (i32, i32) {
    %c0_i32 = arith.constant 0 : i32
    %c0_i32_0 = arith.constant 0 : i32
    %c0_i32_1 = arith.constant 0 : i32
    return %c0_i32, %c0_i32_0 : i32, i32
  }
}

</mosaic_0001>

<bundles_post_ra>
// kernel: bert_class_forward.1
= control target key start
LH: loop header
LB: loop body
LE: loop exit
PB: predicated region body
PF: predicated region fallthrough
CT: control target
= control target key end

     0   :  { %s4407_s0 = inlined_call_operand.vmem [shape: f32[16,128], index: 0, kind: input, shape index: {}]   ;;  %s4408_s1 = inlined_call_operand.vmem [shape: f32[1,128], index: 1, kind: input, shape index: {}]   ;;  %s4409_s2 = inlined_call_operand.vmem [shape: f32[1,128], index: 2, kind: input, shape index: {}]   ;;  %s4410_s3 = inlined_call_operand.hbm [shape: bf16[2,128,384], index: 3, kind: input, shape index: {}]   ;;  %s4411_s4 = inlined_call_operand.vmem [shape: f32[2,1,384], index: 4, kind: input, shape index: {}]   ;;  %s4412_s5 = inlined_call_operand.vmem [shape: bf16[2,128,128], index: 5, kind: input, shape index: {}]   ;;  %s4413_s6 = inlined_call_operand.vmem [shape: f32[2,1,128], index: 6, kind: input, shape index: {}]   ;;  %s4414_s7 = inlined_call_operand.vmem [shape: f32[2,1,128], index: 7, kind: input, shape index: {}]   ;;  %s4415_s8 = inlined_call_operand.vmem [shape: f32[2,1,128], index: 8, kind: input, shape index: {}]   ;;  %s4416_s9 = inlined_call_operand.hbm [shape: bf16[2,128,512], index: 9, kind: input, shape index: {}]   ;;  %s4417_s10 = inlined_call_operand.vmem [shape: f32[2,1,512], index: 10, kind: input, shape index: {}]   ;;  %s4418_s11 = inlined_call_operand.hbm [shape: bf16[2,512,128], index: 11, kind: input, shape index: {}]   ;;  %s4419_s12 = inlined_call_operand.vmem [shape: f32[2,1,128], index: 12, kind: input, shape index: {}]   ;;  %s4420_s13 = inlined_call_operand.vmem [shape: f32[2,1,128], index: 13, kind: input, shape index: {}]   ;;  %s4421_s14 = inlined_call_operand.vmem [shape: f32[2,1,128], index: 14, kind: input, shape index: {}]   ;;  %s4422_s15 = inlined_call_operand.hbm [shape: bf16[128,128], index: 15, kind: input, shape index: {}]   ;;  %s4423_s16 = inlined_call_operand.vmem [shape: f32[1,128], index: 16, kind: input, shape index: {}]   ;;  %s4424_s17 = inlined_call_operand.hbm [shape: f32[2,128], index: 17, kind: output, shape index: {}]  }
   0x1   :  { %4430 = sst [smem:[#allocation19_spill]] %s4407_s0 }
   0x2   :  { %4431 = sst [smem:[#allocation20_spill]] %s4408_s1 }
   0x3   :  { %4432 = sst [smem:[#allocation21_spill]] %s4409_s2 }
   0x4   :  { %4433 = sst [smem:[#allocation22_spill]] %s4410_s3 }
   0x5   :  { %4434 = sst [smem:[#allocation23_spill]] %s4411_s4 }
   0x6   :  { %4435 = sst [smem:[#allocation24_spill]] %s4412_s5 }
   0x7   :  { %4436 = sst [smem:[#allocation25_spill]] %s4415_s8 }
   0x8   :  { %4437 = sst [smem:[#allocation26_spill]] %s4416_s9 }
   0x9   :  { %4438 = sst [smem:[#allocation27_spill]] %s4417_s10 }
   0xa   :  { %4439 = sst [smem:[#allocation28_spill]] %s4418_s11 }
   0xb   :  { %4440 = sst [smem:[#allocation29_spill]] %s4419_s12 }
   0xc   :  { %4441 = sst [smem:[#allocation30_spill]] %s4420_s13 }
   0xd   :  { %4442 = sst [smem:[#allocation31_spill]] %s4421_s14 }
   0xe   :  { %4443 = sst [smem:[#allocation32_spill]] %s4422_s15 }
   0xf   :  { %4444 = sst [smem:[#allocation33_spill]] %s4423_s16 }
  0x10   :  { %4445 = sst [smem:[#allocation34_spill]] %s4424_s17 }
  0x11   :  { %22 = vsyncpa [#allocation4], 0 }
  0x12   :  { %24 = vsyncpa [#allocation4 + $0x1], 0 }
  0x13   :  { %25 = vsyncpa [#allocation7], 0 }
  0x14   :  { %27 = vsyncpa [#allocation7 + $0x1], 0 }
  0x15   :  { %28 = vsyncpa [#allocation10], 0 }
  0x16   :  { %29 = vsyncpa [#allocation5], 0  ;;  %s3796_s24 = smov 0   ;;  %s3798_s25 = smov 0  }
  0x17   :  { %s3800_s26 = smov 0   ;;  %s3802_s27 = smov 0  }
  0x18 LB: > { %4446 = sst [smem:[#allocation16_spill]] %s3687_s26  ;;  %s3817_s28 = sadd.s32 1, %s3691_s27   ;;  %s3691_s27 = sphi %s3802_s27, %s4475_s27   ;;  %s3687_s26 = sphi %s3800_s26, %s4477_s26   ;;  %s3683_s25 = sphi %s3798_s25, %s4479_s25   ;;  %s3679_s24 = sphi %s3796_s24, %s4478_s24  }
  0x19   : > { %4447 = sst [smem:[#allocation17_spill]] %s3817_s28  ;;  %s105_s29 = sadd.s32 1, %s3687_s26 }
  0x1a   : > { %s102_s0 = ssub.s32 %s3691_s27, %s3817_s28  ;;  %p112_p0 = scmp.ne.s32.totalorder %s3687_s26, %s3683_s25 }
  0x1b   : > { %p103_p1 = scmp.eq.s32.totalorder %s102_s0, 0  ;;  %p113_p2 = scmp.eq.s32.totalorder %s3691_s27, 0 }
  0x1c   : > { %p3351_p3 = scmp.lt.s32.totalorder %s3691_s27, 2  ;;  %s3830_s18 = sand.u32 1, %s3687_s26  }
  0x1d   : > { %s3827_s30 = scalar_select %p103_p1, %s3687_s26, %s105_s29  }
  0x1e   : > { %p114_p4 = por %p113_p2, %p112_p0  ;;  %s572_s19 = sand.u32 1, %s3691_s27  }
  0x1f   : > { %4448 = sst [smem:[#allocation18_spill]] %s3827_s30  ;;  %s4429_s1 = sshll.u32 %s3830_s18, 8 }
  0x20   : > { %p3834_p5 = pnand %p3351_p3, %p114_p4  ;;  %s3211_s21 = sshll.u32 %s3691_s27, 8 }
  0x21   : > { %s4450_s9 = sld [smem:[#allocation26_spill]]  ;;  %s576_s30 = scalar_lea.vmem [#allocation6], %s4429_s1 }
  0x22   : > { %s584_s26 = sshll.u32 %s576_s30, 4  ;;  %s3844_s28 = scalar_lea.sflag [#allocation7], %s572_s19  ;;  %s585_s26 = int_to_ptr.vmem [resolvable:$true] %s584_s26 }
  0x23   : > { %p3501_p7 = pneg %p3834_p5 }
  0x27   : > { %s581_s0 = scalar_lea.hbm %s4450_s9, %s3211_s21 }
  0x28   : > { %s582_s29 = sshll.u32 %s581_s0, 4  ;;  %s3504_s0 = scalar_lea.hbm %s4450_s9, 512  ;;  %s583_s29 = int_to_ptr.hbm [resolvable:$true] %s582_s29 }
  0x29   : > { %s3497_s17 = sshra.s32 %s583_s29, 4  ;;  %s3498_s17 = int_to_ptr.hbm [resolvable:$true] %s3497_s17 }
  0x2a   : > { %s3499_s16 = scalar_lea.hbm %s3498_s17, 256  ;;  %p3505_p10 = scmp.lt.s32.totalorder %s3498_s17, %s4450_s9 }
  0x2b   : > { %p3500_p6 = scmp.ne.s32.totalorder %s3498_s17, %s3499_s16  ;;  %p3506_p11 = scmp.lt.s32.totalorder %s3504_s0, %s3499_s16 }
  0x2d   : > { %p3502_p8 = pnand %p3501_p7, %p3500_p6  ;;  %p3507_p12 = por %p3506_p11, %p3505_p10 }
  0x2f   : > { %p3503_p9 = pneg %p3502_p8 }
  0x31   : > { %p3508_p13 = pnand %p3507_p12, %p3503_p9 }
  0x33   : > { %3511 = shalt.err (!%p3508_p13)
}
  0x34   : > { %s3693_s19 = smov 256   ;;  %s3694_s2 = smov 16  }
  0x35   : > { %3346 = dma.hbm_to_vmem [thread:$0]  (!%p3834_p5), %s583_s29, 4096, %s585_s26, %s3844_s28, %s3693_s19, %s3693_s19, %s3694_s2  }
  0x36   : > { %s4451_s11 = sld [smem:[#allocation28_spill]]  ;;  %s4452_s1 = sshll.u32 %s3830_s18, 8 }
  0x37   : > { %s605_s0 = scalar_lea.vmem [#allocation8], %s4452_s1  ;;  %s3870_s9 = sadd.s32 4294967295, %s3691_s27  }
  0x38   : > { %s613_s30 = sshll.u32 %s605_s0, 4  ;;  %p119_p0 = scmp.eq.s32.totalorder %s3870_s9, 0  ;;  %s3867_s30 = int_to_ptr.vmem [resolvable:$true] %s613_s30 }
  0x39   : > { %p118_p1 = scmp.ne.s32.totalorder %s3683_s25, %s3679_s24  ;;  %p2756_p2 = scmp.ge.s32.totalorder %s3691_s27, 1 }
  0x3a   : > { %p478_p3 = scmp.lt.s32.totalorder %s3691_s27, 3  ;;  %p2757_p4 = scmp.ne.s32.totalorder %s3870_s9, 0 }
  0x3b   : > { %p3880_p6 = por %p119_p0, %p118_p1  ;;  %s4454_s15 = sld [smem:[#allocation32_spill]] }
  0x3c   : > { %s610_s17 = scalar_lea.hbm %s4451_s11, %s3211_s21  ;;  %p3887_p8 = pnand %p2756_p2, %p478_p3 }
  0x3d   : > { %s611_s16 = sshll.u32 %s610_s17, 4  ;;  %s3695_s24 = smov [#allocation9]   ;;  %s3865_s16 = int_to_ptr.hbm [resolvable:$true] %s611_s16 }
  0x3e   : > { %p3336_p9 = pneg %p3887_p8  ;;  %s500_s22 = sshll.u32 %s3695_s24, 4  ;;  %s501_s22 = int_to_ptr.vmem [resolvable:$true] %s500_s22 }
  0x3f   : > { %s3318_s23 = smul.u32 192, %s3830_s18  ;;  %s3696_s1 = smov 64  }
  0x40   : > { %p3337_p10 = pnand %p3336_p9, %p119_p0  ;;  %s3319_s17 = smul.u32 192, %s3691_s27 }
  0x41   : > { %s498_s29 = sshll.u32 %s4454_s15, 4  ;;  %s3697_s0 = smov 4   ;;  %s499_s29 = int_to_ptr.hbm [resolvable:$true] %s498_s29 }
  0x42   : > { %3339 = dma.hbm_to_vmem [thread:$0]  (!%p3337_p10), %s499_s29, 1024, %s501_s22, [#allocation10], %s3696_s1, %s3696_s1, %s3697_s0  }
  0x43   : > { %s4456_s3 = sld [smem:[#allocation22_spill]]  ;;  %s521_s13 = scalar_lea.vmem [#allocation3], %s3318_s23 }
  0x44   : > { %s529_s12 = sshll.u32 %s521_s13, 4  ;;  %s518_s24 = scalar_lea.sflag [#allocation4], %s3830_s18  ;;  %s530_s12 = int_to_ptr.vmem [resolvable:$true] %s529_s12 }
  0x49   : > { %s526_s15 = scalar_lea.hbm %s4456_s3, %s3319_s17  ;;  %s3564_s22 = scalar_lea.hbm %s4456_s3, 384 }
  0x4a   : > { %s527_s14 = sshll.u32 %s526_s15, 4  ;;  %s528_s14 = int_to_ptr.hbm [resolvable:$true] %s527_s14 }
  0x4b   : > { %s3557_s10 = sshra.s32 %s528_s14, 4  ;;  %s3558_s10 = int_to_ptr.hbm [resolvable:$true] %s3557_s10 }
  0x4c   : > { %s3559_s8 = scalar_lea.hbm %s3558_s10, 192  ;;  %p3565_p1 = scmp.lt.s32.totalorder %s3558_s10, %s4456_s3 }
  0x4d   : > { %p3560_p11 = scmp.ne.s32.totalorder %s3558_s10, %s3559_s8  ;;  %p3566_p2 = scmp.lt.s32.totalorder %s3564_s22, %s3559_s8 }
  0x4f   : > { %p3562_p12 = pnand %p3560_p11, %p3501_p7  ;;  %p3567_p3 = por %p3566_p2, %p3565_p1 }
  0x51   : > { %p3563_p13 = pneg %p3562_p12 }
  0x53   : > { %p3568_p9 = pnand %p3567_p3, %p3563_p13 }
  0x55   : > { %3571 = shalt.err (!%p3568_p9)
}
  0x56   : > { %s3698_s13 = smov 192   ;;  %s3699_s15 = smov 12  }
  0x57   : > { %3343 = dma.hbm_to_vmem [thread:$0]  (!%p3834_p5), %s528_s14, 3072, %s530_s12, %s518_s24, %s3698_s13, %s3698_s13, %s3699_s15  }
  0x58   : > { %s3587_s18 = sshra.s32 %s3865_s16, 4  ;;  %s3594_s21 = scalar_lea.hbm %s4451_s11, 512  ;;  %s3588_s18 = int_to_ptr.hbm [resolvable:$true] %s3587_s18 }
  0x59   : > { %s3589_s23 = scalar_lea.hbm %s3588_s18, 256  ;;  %p3595_p13 = scmp.lt.s32.totalorder %s3588_s18, %s4451_s11 }
  0x5a   : > { %p3590_p10 = scmp.ne.s32.totalorder %s3588_s18, %s3589_s23  ;;  %p3596_p1 = scmp.lt.s32.totalorder %s3594_s21, %s3589_s23 }
  0x5c   : > { %p3592_p11 = pnand %p3590_p10, %p3501_p7  ;;  %p3597_p2 = por %p3596_p1, %p3595_p13 }
  0x5e   : > { %p3593_p12 = pneg %p3592_p11 }
  0x60   : > { %p3598_p3 = pnand %p3597_p2, %p3593_p12 }
  0x62   : > { %3601 = shalt.err (!%p3598_p3)
}
  0x63   : > { %3349 = dma.hbm_to_vmem [thread:$0]  (!%p3834_p5), %s3865_s16, 4096, %s3867_s30, %s3844_s28, %s3696_s1, %s3696_s1, %s3697_s0  }
  0x64   : > { %643 = sbr.rel (%p3887_p8) target bundleno = 2586 (0xa1a), region = 88  ;;  %s645_s12 = sand.u32 (!%p3887_p8), 1, %s3683_s25  }
  0x65   : > { %s3320_s14 = smul.u32 (!%p3887_p8), 192, %s645_s12  ;;  %s646_s24 = scalar_lea.sflag (!%p3887_p8), [#allocation4], %s645_s12 }
  0x67   : > { %s3936_s22 = scalar_lea.vmem (!%p3887_p8), [#allocation3], %s3320_s14 }
  0x69   : > { %3662 = dma.done.wait (%p3880_p6), %s646_s24, 3072  }
  0x6a   : > { %3664 = vsyncadd (%p3880_p6), %s646_s24, 4294964224  ;;  %s655_s20 = sand.u32 1, %s3870_s9   ;;  %s2767_s26 = sshll.u32 %s645_s12, 8 }
  0x6b   : > { %s656_s28 = scalar_lea.sflag [#allocation7], %s655_s20  ;;  %s3943_s16 = scalar_lea.vmem [#allocation6], %s2767_s26 }
  0x6c   : > { %3666 = dma.done.wait (%p3880_p6), %s656_s28, 8192  }
  0x6d   : > { %3668 = vsyncadd (%p3880_p6), %s656_s28, 4294959104  ;;  %s3949_s30 = scalar_lea.vmem [#allocation8], %s2767_s26 }
  0x6e   : > { %3670 = dma.done.wait (%p119_p0), [#allocation10], 1024  }
  0x6f   : > { %3672 = vsyncadd (%p119_p0), [#allocation10], 4294966272  ;;  %p762_p5 = scmp.lt.s32.totalorder %s3870_s9, 1  ;;  %s4457_s5 = sld [smem:[#allocation24_spill]] }
  0x70   : > { %s4458_s4 = sld [smem:[#allocation23_spill]] }
  0x71   : > { %s3957_s19 = scalar_select %p762_p5, %s3870_s9, 1 }
  0x72   : > { %s4459_s20 = sld [smem:[#allocation25_spill]] }
  0x73   : > { %s3321_s2 = smul.u32 3, %s3957_s19  ;;  %s3213_s1 = sshll.u32 %s3957_s19, 6 }
  0x74   : > { %s2772_s28 = sshll.u32 %s3957_s19, 2  ;;  %s4460_s17 = sld [smem:[#allocation27_spill]] }
  0x75   : > { %s3964_s13 = scalar_lea.vmem %s4457_s5, %s3213_s1  ;;  %s4461_s23 = sld [smem:[#allocation29_spill]] }
  0x76   : > { %s3973_s21 = scalar_lea.vmem %s4458_s4, %s3321_s2  ;;  %s4462_s4 = sld [smem:[#allocation30_spill]] }
  0x77   : > { %s4463_s12 = sld [smem:[#allocation31_spill]] }
  0x78   : > { %s779_s26 = scalar_lea.vmem %s4459_s20, %s3957_s19  ;;  %s4464_s20 = sld [smem:[#allocation19_spill]] (!%p2757_p4) }
  0x79   : > { %797 = sbr.rel (%p2757_p4) target bundleno = 402 (0x192), region = 108  ;;  %s4466_s15 = sld [smem:[#allocation21_spill]] (!%p2757_p4) }
  0x7a   : > { %s3987_s3 = scalar_lea.vmem %s4460_s17, %s2772_s28 }
  0x7b   : > { %s786_s10 = scalar_lea.vmem %s4461_s23, %s3957_s19 }
  0x7c   : > { %s789_s5 = scalar_lea.vmem %s4462_s4, %s3957_s19 }
  0x7d   : > { %s792_s11 = scalar_lea.vmem %s4463_s12, %s3957_s19  ;;  %s4465_s12 = sld [smem:[#allocation20_spill]] (!%p2757_p4) }
  0x7e   : > { %v798_v0 = vld [vmem:[%s4464_s20] sm:$0xff]  ;;  %v799_v1 = vld [vmem:[%s4464_s20 + $0x8] sm:$0xff]  ;;  %v3700_v2 = vmov 128.0  }
  0x7f   : > { %802 = vadd.xlane.f32.xlu0 %v798_v0  ;;  %3402 = vrcp.f32 %v3700_v2  ;;  %v3401_v34 = vld [vmem:[%s4466_s15] ss:$0 sm:$0xff] }
  0x83   : > { %v3400_v31 = vld [vmem:[%s4465_s12] ss:$0 sm:$0xff] }
  0x85   : > { %v3403_v3 = vpop.eup %3402 }
  0x86   : > { %v807_v4 = vmul.f32 128.0, %v3403_v3  ;;  %vm811_vm0 = vweird.f32 %v3403_v3 }
  0x87   : > { %804 = vadd.xlane.f32.xlu0 %v799_v1 }
  0x88   : > { %v808_v5 = vsub.f32 1.0, %v807_v4 }
  0x8a   : > { %v809_v6 = vmul.f32 %v3403_v3, %v808_v5 }
  0x8c   : > { %v810_v7 = vadd.f32 %v3403_v3, %v809_v6 }
  0x8e   : > { %v812_v8 = vsel %vm811_vm0, %v3403_v3, %v810_v7 }
  0xf2   : > { %v803_v9 = vpop.xlane.xlu0 %802 }
  0xf3   : > { %v813_v10 = vmul.f32 %v812_v8, %v803_v9 }
  0xf5   : > { %v815_v11 = vsub.f32 %v798_v0, %v813_v10 }
  0xf7   : > { %v817_v12 = vmul.f32 %v815_v11, %v815_v11 }
  0xf9   : > { %819 = vadd.xlane.f32.xlu1 %v817_v12 }
  0xfa   : > { %v805_v13 = vpop.xlane.xlu0 %804 }
  0xfb   : > { %v814_v14 = vmul.f32 %v812_v8, %v805_v13 }
  0xfd   : > { %v816_v15 = vsub.f32 %v799_v1, %v814_v14 }
  0xff   : > { %v818_v16 = vmul.f32 %v816_v15, %v816_v15 }
 0x101   : > { %821 = vadd.xlane.f32.xlu1 %v818_v16 }
 0x16c   : > { %v820_v17 = vpop.xlane.xlu1 %819 }
 0x16d   : > { %v823_v18 = vmul.f32 %v820_v17, %v812_v8 }
 0x16f   : > { %v825_v19 = vadd.f32 1e-12, %v823_v18 }
 0x171   : > { %3404 = vrsqrt.f32 %v825_v19  ;;  %vm833_vm2 = vweird.f32 %v825_v19 }
 0x174   : > { %v822_v20 = vpop.xlane.xlu1 %821 }
 0x175   : > { %v824_v21 = vmul.f32 %v822_v20, %v812_v8 }
 0x177   : > { %v3405_v22 = vpop.eup %3404  ;;  %v826_v23 = vadd.f32 1e-12, %v824_v21 }
 0x178   : > { %v828_v24 = vmul.f32 %v3405_v22, %v825_v19  ;;  %vm834_vm1 = vweird.f32 %v3405_v22 }
 0x179   : > { %3406 = vrsqrt.f32 %v826_v23  ;;  %vm835_vm3 = vmor %vm833_vm2, %vm834_vm1  ;;  %vm843_vm5 = vweird.f32 %v826_v23 }
 0x17a   : > { %v829_v25 = vmul.f32 %v3405_v22, %v828_v24 }
 0x17c   : > { %v830_v26 = vmul.f32 0.5, %v829_v25 }
 0x17e   : > { %v831_v27 = vsub.f32 1.5, %v830_v26 }
 0x17f   : > { %v3407_v28 = vpop.eup %3406 }
 0x180   : > { %v832_v29 = vmul.f32 %v3405_v22, %v831_v27  ;;  %v838_v30 = vmul.f32 %v3407_v28, %v826_v23  ;;  %vm844_vm4 = vweird.f32 %v3407_v28 }
 0x181   : > { %vm845_vm6 = vmor %vm843_vm5, %vm844_vm4 }
 0x182   : > { %v836_v32 = vsel %vm835_vm3, %v3405_v22, %v832_v29  ;;  %v839_v33 = vmul.f32 %v3407_v28, %v838_v30 }
 0x183   : > { %v847_v35 = vmul.f32 %v836_v32, %v815_v11 }
 0x184   : > { %v840_v36 = vmul.f32 0.5, %v839_v33 }
 0x185   : > { %v852_v37 = vmul.f32 %v3400_v31, %v847_v35 }
 0x186   : > { %v841_v38 = vsub.f32 1.5, %v840_v36 }
 0x187   : > { %v857_v39 = vadd.f32 %v3401_v34, %v852_v37 }
 0x188   : > { %v842_v40 = vmul.f32 %v3407_v28, %v841_v38 }
 0x189   : > { %859 = vst [vmem:[#allocation2] sm:$0xff] %v857_v39 }
 0x18a   : > { %v846_v41 = vsel %vm845_vm6, %v3407_v28, %v842_v40 }
 0x18b   : > { %v848_v42 = vmul.f32 %v846_v41, %v816_v15 }
 0x18d   : > { %v853_v43 = vmul.f32 %v3400_v31, %v848_v42 }
 0x18f   : > { %v858_v44 = vadd.f32 %v3401_v34, %v853_v43 }
 0x191   : > { %860 = vst [vmem:[#allocation2 + $0x8] sm:$0xff] %v858_v44 }
 0x192 PF: > { %v2860_v45 = vld [vmem:[%s3936_s22 + $0xa8] sm:$0xf]  ;;  %v3236_v46 = vld [vmem:[%s3936_s22 + $0xb0] sm:$0xf0]  ;;  %v3235_v47 = vld [vmem:[%s3936_s22 + $0xac] sm:$0xf]  ;;  %s4467_s8 = scalar_lea.vmem %s4413_s6, %s3957_s19  ;;  %s4468_s29 = scalar_lea.vmem %s4414_s7, %s3957_s19 }
 0x193   : > { %v2861_v48 = vor.u32 %v3236_v46, %v2860_v45  ;;  %v2862_v49 = vld [vmem:[%s3936_s22 + $0xb4] sm:$0xf0]  ;;  %v2848_v50 = vld [vmem:[%s3936_s22 + $0x90] sm:$0xf]  ;;  %v3233_v51 = vld [vmem:[%s3936_s22 + $0x98] sm:$0xf0] }
 0x194   : > { %v2865_v52 = vor.u32 %v3235_v47, %v2862_v49  ;;  %v3232_v53 = vld [vmem:[%s3936_s22 + $0x94] sm:$0xf]  ;;  %v2850_v54 = vld [vmem:[%s3936_s22 + $0x9c] sm:$0xf0]  ;;  %v2849_v55 = vor.u32 %v3233_v51, %v2848_v50  ;;  %v2836_v57 = vld [vmem:[%s3936_s22 + $0x78] sm:$0xf] }
 0x195   : > { %1032 = vmatpush.bf16.msra.mxu0 %v2861_v48  ;;  %v2853_v56 = vor.u32 %v3232_v53, %v2850_v54  ;;  %v3230_v58 = vld [vmem:[%s3936_s22 + $0x80] sm:$0xf0]  ;;  %v3229_v59 = vld [vmem:[%s3936_s22 + $0x7c] sm:$0xf]  ;;  %v2838_v60 = vld [vmem:[%s3936_s22 + $0x84] sm:$0xf0] }
 0x196   : > { %1046 = vmatpush.bf16.msra.mxu1 %v2865_v52  ;;  %v2837_v61 = vor.u32 %v3230_v58, %v2836_v57  ;;  %v2841_v62 = vor.u32 %v3229_v59, %v2838_v60  ;;  %v2824_v63 = vld [vmem:[%s3936_s22 + $0x60] sm:$0xf]  ;;  %v3227_v0 = vld [vmem:[%s3936_s22 + $0x68] sm:$0xf0]  ;;  %v3226_v1 = vld [vmem:[%s3936_s22 + $0x64] sm:$0xf] }
 0x197   : > { %v2826_v2 = vld [vmem:[%s3936_s22 + $0x6c] sm:$0xf0]  ;;  %v2825_v3 = vor.u32 %v3227_v0, %v2824_v63  ;;  %v2812_v4 = vld [vmem:[%s3936_s22 + $0x48] sm:$0xf]  ;;  %v3237_v6 = vld [vmem:[%s3936_s22 + $0xb8] sm:$0xf0] }
 0x198   : > { %v2868_v5 = vld [vmem:[%s3936_s22 + $0xb0] sm:$0xf]  ;;  %v2829_v7 = vor.u32 %v3226_v1, %v2826_v2  ;;  %v3224_v8 = vld [vmem:[%s3936_s22 + $0x50] sm:$0xf0]  ;;  %v2856_v10 = vld [vmem:[%s3936_s22 + $0x98] sm:$0xf] }
 0x199   : > { %1033 = vmatpush.bf16.msra.mxu0 %v2849_v55  ;;  %v2869_v9 = vor.u32 %v3237_v6, %v2868_v5  ;;  %v3234_v11 = vld [vmem:[%s3936_s22 + $0xa0] sm:$0xf0]  ;;  %v3223_v12 = vld [vmem:[%s3936_s22 + $0x4c] sm:$0xf]  ;;  %v2814_v13 = vld [vmem:[%s3936_s22 + $0x54] sm:$0xf0]  ;;  %v2813_v16 = vor.u32 %v3224_v8, %v2812_v4 }
 0x19a   : > { %1047 = vmatpush.bf16.msra.mxu1 %v2853_v56  ;;  %v2800_v14 = vld [vmem:[%s3936_s22 + $0x30] sm:$0xf]  ;;  %v2857_v15 = vor.u32 %v3234_v11, %v2856_v10  ;;  %v3221_v17 = vld [vmem:[%s3936_s22 + $0x38] sm:$0xf0]  ;;  %v2844_v18 = vld [vmem:[%s3936_s22 + $0x80] sm:$0xf]  ;;  %v2817_v20 = vor.u32 %v3223_v12, %v2814_v13 }
 0x19b   : > { %1060 = vmatpush.bf16.msra.mxu2 %v2869_v9  ;;  %v3231_v19 = vld [vmem:[%s3936_s22 + $0x88] sm:$0xf0]  ;;  %v3220_v21 = vld [vmem:[%s3936_s22 + $0x34] sm:$0xf]  ;;  %v2802_v22 = vld [vmem:[%s3936_s22 + $0x3c] sm:$0xf0]  ;;  %v2801_v24 = vor.u32 %v3221_v17, %v2800_v14 }
 0x19c   : > { %v2845_v23 = vor.u32 %v3231_v19, %v2844_v18  ;;  %v2832_v25 = vld [vmem:[%s3936_s22 + $0x68] sm:$0xf]  ;;  %v3228_v26 = vld [vmem:[%s3936_s22 + $0x70] sm:$0xf0]  ;;  %v2805_v27 = vor.u32 %v3220_v21, %v2802_v22  ;;  %v2788_v28 = vld [vmem:[%s3936_s22 + $0x18] sm:$0xf] }
 0x19d   : > { %1034 = vmatpush.bf16.msra.mxu0 %v2837_v61  ;;  %v3218_v29 = vld [vmem:[%s3936_s22 + $0x20] sm:$0xf0]  ;;  %v3217_v30 = vld [vmem:[%s3936_s22 + $0x1c] sm:$0xf]  ;;  %v2790_v31 = vld [vmem:[%s3936_s22 + $0x24] sm:$0xf0]  ;;  %v2833_v32 = vor.u32 %v3228_v26, %v2832_v25 }
 0x19e   : > { %1048 = vmatpush.bf16.msra.mxu1 %v2841_v62  ;;  %v2789_v33 = vor.u32 %v3218_v29, %v2788_v28  ;;  %v2820_v34 = vld [vmem:[%s3936_s22 + $0x50] sm:$0xf]  ;;  %v3225_v35 = vld [vmem:[%s3936_s22 + $0x58] sm:$0xf0]  ;;  %v2793_v36 = vor.u32 %v3217_v30, %v2790_v31  ;;  %v2776_v37 = vld [vmem:[%s3936_s22] sm:$0xf] }
 0x19f   : > { %1061 = vmatpush.bf16.msra.mxu2 %v2857_v15  ;;  %v3215_v38 = vld [vmem:[%s3936_s22 + $0x8] sm:$0xf0]  ;;  %v3214_v39 = vld [vmem:[%s3936_s22 + $0x4] sm:$0xf]  ;;  %v2778_v40 = vld [vmem:[%s3936_s22 + $0xc] sm:$0xf0]  ;;  %v2821_v42 = vor.u32 %v3225_v35, %v2820_v34 }
 0x1a0   : > { %v4057_v41 = vld [vmem:[#allocation2] sm:$0xff]  ;;  %v2777_v43 = vor.u32 %v3215_v38, %v2776_v37  ;;  %v4059_v44 = vld [vmem:[#allocation2 + $0x8] sm:$0xff]  ;;  %v3222_v46 = vld [vmem:[%s3936_s22 + $0x40] sm:$0xf0]  ;;  %v2781_v47 = vor.u32 %v3214_v39, %v2778_v40  ;;  %vm1158_vm7 = vcmask 261120   ;;  %s3701_s18 = smov 32  }
 0x1a1   : > { %1035 = vmatpush.bf16.msra.mxu0 %v2825_v3  ;;  %v2808_v45 = vld [vmem:[%s3936_s22 + $0x38] sm:$0xf]  ;;  %v863_v48 = vpack.c.bf16 %v4059_v44, %v4057_v41  ;;  %v2796_v50 = vld [vmem:[%s3936_s22 + $0x20] sm:$0xf]  ;;  %v3219_v51 = vld [vmem:[%s3936_s22 + $0x28] sm:$0xf0] }
 0x1a2   : > { %1049 = vmatpush.bf16.msra.mxu1 %v2829_v7  ;;  %v2809_v49 = vor.u32 %v3222_v46, %v2808_v45  ;;  %v2797_v52 = vor.u32 %v3219_v51, %v2796_v50  ;;  %v2784_v53 = vld [vmem:[%s3936_s22 + $0x8] sm:$0xf]  ;;  %v3216_v54 = vld [vmem:[%s3936_s22 + $0x10] sm:$0xf0]  ;;  %v4070_v56 = vld [vmem:[%s3973_s21] sm:$0x7] }
 0x1a3   : > { %1062 = vmatpush.bf16.msra.mxu2 %v2845_v23  ;;  %v2785_v55 = vor.u32 %v3216_v54, %v2784_v53  ;;  %v899_v57 = vperm.slane %v4070_v56, 1  ;;  %v898_v59 = vperm.slane %v4070_v56, 0  ;;  %s3702_s2 = smov 64   ;;  %s3703_s22 = smov 96   ;;  %vm1311_vm8 = vcmask 64512  }
 0x1a4   : > { %v900_v50 = vperm.slane %v4070_v56, 2  ;;  %vm1411_vm9 = vcmask 1043456   ;;  %vm1587_vm10 = vcmask 523264   ;;  %vm1590_vm11 = vcmask 785408   ;;  %p3174_p7 = scmp.ne.s32.totalorder %s3870_s9, 1 }
 0x1a5   : > { %1036 = vmatpush.bf16.msra.mxu0 %v2813_v16  ;;  %s4473_s19 = sld [smem:[#allocation33_spill]] (!%p3174_p7) }
 0x1a6   : > { %1050 = vmatpush.bf16.msra.mxu1 %v2817_v20 }
 0x1a7   : > { %1063 = vmatpush.bf16.msra.mxu2 %v2833_v32 }
 0x1a9   : > { %1037 = vmatpush.bf16.msra.mxu0 %v2801_v24 }
 0x1aa   : > { %1051 = vmatpush.bf16.msra.mxu1 %v2805_v27 }
 0x1ab   : > { %1064 = vmatpush.bf16.msra.mxu2 %v2821_v42 }
 0x1ad   : > { %1038 = vmatpush.bf16.msra.mxu0 %v2789_v33 }
 0x1ae   : > { %1052 = vmatpush.bf16.msra.mxu1 %v2793_v36 }
 0x1af   : > { %1065 = vmatpush.bf16.msra.mxu2 %v2809_v49 }
 0x1b1   : > { %1039 = vmatpush.bf16.msra.mxu0 %v2777_v43 }
 0x1b2   : > { %1053 = vmatpush.bf16.msra.mxu1 %v2781_v47 }
 0x1b3   : > { %1066 = vmatpush.bf16.msra.mxu2 %v2797_v52 }
 0x1b4   : > { %1040 = vmatmul.bf16.vlgmr.msra.gmra.mxu0 %v863_v48 }
 0x1b5   : > { %1054 = vmatmul.bf16.vlgmr.msra.gmra.mxu1 %v863_v48 }
 0x1b7   : > { %1067 = vmatpush.bf16.msra.mxu2 %v2785_v55 }
 0x1ba   : > { %1068 = vmatmul.bf16.vlgmr.msra.gmra.mxu2 %v863_v48 }
 0x231   : > { %v1041_v61 = vpop.f32.mrf.mxu0 }
 0x232   : > { %v1055_v58 = vpop.f32.mrf.mxu1  ;;  %v1042_v63 = vadd.f32 %v1041_v61, %v898_v59 }
 0x233   : > { %v1056_v60 = vadd.f32 %v1055_v58, %v899_v57 }
 0x234   : > { %v1094_v3 = vpack.c.bf16 %v1042_v63, %v1042_v63 }
 0x235   : > { %1116 = vrot.lane.b32.xlu2 %v1056_v60, %s3701_s18  ;;  %1110 = vrot.lane.b32.xlu1 %v1056_v60, %s3702_s2  ;;  %v1122_v62 = vpack.c.bf16 %v1056_v60, %v1056_v60 }
 0x236   : > { %1104 = vrot.lane.b32.xlu0 %v1056_v60, %s3703_s22 }
 0x237   : > { %v1163_v0 = vsel %vm1158_vm7, %v1122_v62, 0 }
 0x238   : > { %1172 = vmatpush.bf16.xpose.msra.mxu3 %v1163_v0 }
 0x239   : > { %v1043_v5 = vpop.f32.mrf.mxu0 }
 0x23a   : > { %v1057_v1 = vpop.f32.mrf.mxu1  ;;  %v1044_v7 = vadd.f32 %v1043_v5, %v898_v59 }
 0x23b   : > { %v1058_v2 = vadd.f32 %v1057_v1, %v899_v57 }
 0x23c   : > { %v1098_v8 = vpack.c.bf16 %v1044_v7, %v1044_v7 }
 0x23d   : > { %1106 = vrot.lane.b32.xlu2 %v1058_v2, %s3703_s22  ;;  %1082 = vrot.lane.b32.xlu1 %v1042_v63, %s3702_s2  ;;  %v1126_v4 = vpack.c.bf16 %v1058_v2, %v1058_v2  ;;  %v1069_v26 = vpop.f32.mrf.mxu2 }
 0x23e   : > { %1076 = vrot.lane.b32.xlu0 %v1042_v63, %s3703_s22  ;;  %v4111_v55 = vadd.f32 %v1069_v26, %v900_v50 }
 0x23f   : > { %2870 = vmatmul.msk.bf16.vlgmr.msra.gmra.mxu3 %vm1158_vm7, %v1094_v3  ;;  %v1239_v6 = vsel %vm1158_vm7, %v1126_v4, 0 }
 0x240   : > { %1248 = vmatpush.bf16.xpose.msrb.mxu2 %v1239_v6  ;;  %v1150_v59 = vpack.c.bf16 %v4111_v55, %v4111_v55 }
 0x242   : > { %v1413_v62 = vsel %vm1411_vm9, %v1150_v59, 0 }
 0x243   : > { %1422 = vmatpush.bf16.msrb.mxu1 %v1413_v62 }
 0x245   : > { %1078 = vrot.lane.b32.xlu2 %v1044_v7, %s3703_s22  ;;  %1088 = vrot.lane.b32.xlu1 %v1042_v63, %s3701_s18  ;;  %v1071_v34 = vpop.f32.mrf.mxu2 }
 0x246   : > { %1112 = vrot.lane.b32.xlu0 %v1058_v2, %s3702_s2  ;;  %v4113_v57 = vadd.f32 %v1071_v34, %v900_v50 }
 0x247   : > { %2874 = vmatmul.msk.bf16.vlgmr.msrb.gmra.mxu2 %vm1158_vm7, %v1098_v8 }
 0x248   : > { %v1154_v56 = vpack.c.bf16 %v4113_v57, %v4113_v57  ;;  %v3408_v6 = vpack.i.bf16 %v4113_v57, %v4111_v55 }
 0x24a   : > { %v1489_v63 = vsel %vm1411_vm9, %v1154_v56, 0 }
 0x24b   : > { %1498 = vmatpush.bf16.msra.mxu1 %v1489_v63 }
 0x24d   : > { %1090 = vrot.lane.b32.xlu2 %v1044_v7, %s3701_s18  ;;  %1118 = vrot.lane.b32.xlu1 %v1058_v2, %s3701_s18 }
 0x24e   : > { %1084 = vrot.lane.b32.xlu0 %v1044_v7, %s3702_s2 }
 0x28f   : > { %v1117_v9 = vpop.permute.xlu2 %1116 }
 0x290   : > { %v1125_v10 = vpack.c.bf16 %v1117_v9, %v1117_v9 }
 0x292   : > { %v1220_v11 = vsel %vm1158_vm7, %v1125_v10, 0 }
 0x293   : > { %1229 = vmatpush.bf16.xpose.msrb.mxu0 %v1220_v11 }
 0x297   : > { %v1107_v12 = vpop.permute.xlu2 %1106 }
 0x298   : > { %v1127_v13 = vpack.c.bf16 %v1107_v12, %v1107_v12 }
 0x29a   : > { %v1258_v14 = vsel %vm1158_vm7, %v1127_v13, 0 }
 0x29b   : > { %1267 = vmatpush.bf16.xpose.msra.mxu2 %v1258_v14 }
 0x29f   : > { %v1079_v15 = vpop.permute.xlu2 %1078 }
 0x2a0   : > { %v1099_v16 = vpack.c.bf16 %v1079_v15, %v1079_v15 }
 0x2a2   : > { %2875 = vmatmul.msk.bf16.vlgmr.msra.gmra.mxu2 %vm1158_vm7, %v1099_v16 }
 0x2a7   : > { %v1111_v17 = vpop.permute.xlu1 %1110  ;;  %v1091_v39 = vpop.permute.xlu2 %1090 }
 0x2a8   : > { %v1124_v18 = vpack.c.bf16 %v1111_v17, %v1111_v17  ;;  %v1105_v19 = vpop.permute.xlu0 %1104  ;;  %v1101_v40 = vpack.c.bf16 %v1091_v39, %v1091_v39 }
 0x2a9   : > { %v1123_v20 = vpack.c.bf16 %v1105_v19, %v1105_v19 }
 0x2aa   : > { %v1201_v21 = vsel %vm1158_vm7, %v1124_v18, 0 }
 0x2ab   : > { %v1182_v22 = vsel %vm1158_vm7, %v1123_v20, 0 }
 0x2ac   : > { %1191 = vmatpush.bf16.xpose.msrb.mxu3 %v1182_v22 }
 0x2af   : > { %v1083_v23 = vpop.permute.xlu1 %1082 }
 0x2b0   : > { %v1077_v24 = vpop.permute.xlu0 %1076  ;;  %v1096_v35 = vpack.c.bf16 %v1083_v23, %v1083_v23 }
 0x2b1   : > { %v1095_v25 = vpack.c.bf16 %v1077_v24, %v1077_v24 }
 0x2b3   : > { %2871 = vmatmul.msk.bf16.vlgmr.msrb.gmra.mxu3 %vm1158_vm7, %v1095_v25 }
 0x2b4   : > { %1210 = vmatpush.bf16.xpose.msra.mxu3 %v1201_v21 }
 0x2b7   : > { %v1089_v27 = vpop.permute.xlu1 %1088 }
 0x2b8   : > { %v1097_v28 = vpack.c.bf16 %v1089_v27, %v1089_v27  ;;  %v1113_v29 = vpop.permute.xlu0 %1112 }
 0x2b9   : > { %v1128_v30 = vpack.c.bf16 %v1113_v29, %v1113_v29 }
 0x2ba   : > { %2873 = vmatmul.msk.bf16.vlgmr.msrb.gmra.mxu0 %vm1158_vm7, %v1097_v28 }
 0x2bb   : > { %v1277_v31 = vsel %vm1158_vm7, %v1128_v30, 0 }
 0x2bc   : > { %1286 = vmatpush.bf16.xpose.msrb.mxu3 %v1277_v31 }
 0x2bf   : > { %v1119_v32 = vpop.permute.xlu1 %1118 }
 0x2c0   : > { %v1129_v33 = vpack.c.bf16 %v1119_v32, %v1119_v32  ;;  %v1085_v45 = vpop.permute.xlu0 %1084 }
 0x2c1   : > { %v1100_v46 = vpack.c.bf16 %v1085_v45, %v1085_v45 }
 0x2c2   : > { %v1296_v36 = vsel %vm1158_vm7, %v1129_v33, 0  ;;  %v4099_v37 = vpop.f32.mrf.mxu3 }
 0x2c3   : > { %2872 = vmatmul.msk.bf16.vlgmr.msra.gmra.mxu3 %vm1158_vm7, %v1096_v35  ;;  %1305 = vmatpush.bf16.xpose.msra.mxu0 %v1296_v36  ;;  %v1312_v38 = vsel %vm1311_vm8, %v4099_v37, -inf }
 0x2c4   : > { %1313 = vmax.xlane.f32.xlu2 %v1312_v38 }
 0x2ca   : > { %v1176_v42 = vpop.f32.mrf.mxu3  ;;  %v4104_v43 = vpop.f32.mrf.mxu2  ;;  %2877 = vmatmul.msk.bf16.vlgmr.msra.gmra.mxu0 %vm1158_vm7, %v1101_v40 }
 0x2cb   : > { %v1324_v9 = vsel %vm1311_vm8, %v4104_v43, -inf }
 0x2d2   : > { %v1252_v47 = vpop.f32.mrf.mxu2 }
 0x2d3   : > { %2876 = vmatmul.msk.bf16.vlgmr.msrb.gmra.mxu3 %vm1158_vm7, %v1100_v46 }
 0x325   : > { %v1269_v48 = vpop.f32.mrf.mxu2 }
 0x326   : > { %v1327_v61 = vsel %vm1311_vm8, %v1269_v48, -inf }
 0x32d   : > { %v1271_v49 = vpop.f32.mrf.mxu2 }
 0x336   : > { %v1193_v51 = vpop.f32.mrf.mxu3 }
 0x337   : > { %v1231_v52 = vpop.f32.mrf.mxu0  ;;  %v1315_v53 = vsel %vm1311_vm8, %v1193_v51, -inf  ;;  %v1314_v11 = vpop.xlane.xlu2 %1313 }
 0x338   : > { %1316 = vmax.xlane.f32.xlu0 %v1315_v53  ;;  %v1321_v54 = vsel %vm1311_vm8, %v1231_v52, -inf  ;;  %v1336_v42 = vsub.f32 %v4099_v37, %v1314_v11 }
 0x339   : > { %1322 = vmax.xlane.f32.xlu2 %v1321_v54 }
 0x33e   : > { %v1195_v58 = vpop.f32.mrf.mxu3 }
 0x33f   : > { %v1233_v60 = vpop.f32.mrf.mxu0 }
 0x341   : > { %1328 = vmax.xlane.f32.xlu2 %v1327_v61 }
 0x346   : > { %v1212_v0 = vpop.f32.mrf.mxu3 }
 0x347   : > { %v4122_v1 = vpop.f32.mrf.mxu0  ;;  %v1318_v5 = vsel %vm1311_vm8, %v1212_v0, -inf }
 0x348   : > { %v1333_v2 = vsel %vm1311_vm8, %v4122_v1, -inf }
 0x349   : > { %1334 = vmax.xlane.f32.xlu1 %v1333_v2 }
 0x34e   : > { %v1214_v3 = vpop.f32.mrf.mxu3 }
 0x34f   : > { %v1309_v4 = vpop.f32.mrf.mxu0 }
 0x351   : > { %1319 = vmax.xlane.f32.xlu1 %v1318_v5 }
 0x356   : > { %v1288_v7 = vpop.f32.mrf.mxu3 }
 0x357   : > { %v1330_v8 = vsel %vm1311_vm8, %v1288_v7, -inf }
 0x358   : > { %1331 = vmax.xlane.f32.xlu0 %v1330_v8 }
 0x359   : > { %1325 = vmax.xlane.f32.xlu1 %v1324_v9  ;;  %3409 = vrot.lane.b32.xlu2 %v3408_v6, %s3703_s22 }
 0x35e   : > { %v1290_v10 = vpop.f32.mrf.mxu3 }
 0x36c   : > { %3414 = vrot.lane.b32.xlu0 %v3408_v6, %s3702_s2 }
 0x3ab   : > { %v1317_v12 = vpop.xlane.xlu0 %1316 }
 0x3ac   : > { %v1337_v13 = vsub.f32 %v1193_v51, %v1317_v12  ;;  %v1323_v14 = vpop.xlane.xlu2 %1322 }
 0x3ad   : > { %v1339_v15 = vsub.f32 %v1231_v52, %v1323_v14 }
 0x3ae   : > { %v1346_v16 = vmul.f32 1.442695, %v1337_v13 }
 0x3af   : > { %v1350_v17 = vmul.f32 1.442695, %v1339_v15 }
 0x3b0   : > { %3439 = vpow2.f32 %v1346_v16 }
 0x3b1   : > { %3441 = vpow2.f32 %v1350_v17 }
 0x3b4   : > { %v1329_v18 = vpop.xlane.xlu2 %1328 }
 0x3b5   : > { %v1341_v19 = vsub.f32 %v1269_v48, %v1329_v18  ;;  %v1344_v48 = vmul.f32 1.442695, %v1336_v42 }
 0x3b6   : > { %v4134_v20 = vpop.eup %3439 }
 0x3b7   : > { %v4136_v21 = vpop.eup %3441  ;;  %v1354_v22 = vmul.f32 1.442695, %v1341_v19  ;;  %v1363_v23 = vsel %vm1311_vm8, %v4134_v20, 0.0 }
 0x3b8   : > { %1364 = vadd.xlane.f32.xlu0 %v1363_v23  ;;  %v1369_v24 = vsel %vm1311_vm8, %v4136_v21, 0.0 }
 0x3b9   : > { %3443 = vpow2.f32 %v1354_v22  ;;  %1370 = vadd.xlane.f32.xlu1 %v1369_v24 }
 0x3bc   : > { %v1335_v25 = vpop.xlane.xlu1 %1334  ;;  %v3410_v26 = vpop.permute.xlu2 %3409 }
 0x3bd   : > { %v3412_v27 = vunpack.i.h.bf16 %v3410_v26  ;;  %v3411_v28 = vunpack.i.l.bf16 %v3410_v26 }
 0x3bf   : > { %v4142_v29 = vpop.eup %3443  ;;  %v1155_v30 = vpack.c.bf16 %v3412_v27, %v3412_v27  ;;  %v1151_v31 = vpack.c.bf16 %v3411_v28, %v3411_v28 }
 0x3c0   : > { %v1375_v32 = vsel %vm1311_vm8, %v4142_v29, 0.0 }
 0x3c1   : > { %1376 = vadd.xlane.f32.xlu0 %v1375_v32  ;;  %v1432_v33 = vsel %vm1411_vm9, %v1151_v31, 0  ;;  %v1508_v34 = vsel %vm1411_vm9, %v1155_v30, 0 }
 0x3c2   : > { %1441 = vmatpush.bf16.msrb.mxu2 %v1432_v33 }
 0x3c4   : > { %v1320_v35 = vpop.xlane.xlu1 %1319 }
 0x3c5   : > { %v1338_v36 = vsub.f32 %v1212_v0, %v1320_v35  ;;  %v1343_v0 = vsub.f32 %v4122_v1, %v1335_v25 }
 0x3c6   : > { %1517 = vmatpush.bf16.msra.mxu2 %v1508_v34 }
 0x3c7   : > { %v1348_v38 = vmul.f32 1.442695, %v1338_v36  ;;  %v1358_v2 = vmul.f32 1.442695, %v1343_v0  ;;  %v3244_v0 = vld [vmem:[%s3964_s13 + $0x30] sm:$0xff] }
 0x3c9   : > { %3445 = vpow2.f32 %v1348_v38 }
 0x3cb   : > { %v1332_v39 = vpop.xlane.xlu0 %1331 }
 0x3cc   : > { %v1342_v40 = vsub.f32 %v1288_v7, %v1332_v39  ;;  %v1326_v49 = vpop.xlane.xlu1 %1325 }
 0x3cd   : > { %v1340_v51 = vsub.f32 %v4104_v43, %v1326_v49 }
 0x3ce   : > { %v1356_v45 = vmul.f32 1.442695, %v1342_v40 }
 0x3cf   : > { %v3446_v46 = vpop.eup %3445  ;;  %v1352_v53 = vmul.f32 1.442695, %v1340_v51 }
 0x3d0   : > { %3447 = vpow2.f32 %v1356_v45  ;;  %v1366_v47 = vsel %vm1311_vm8, %v3446_v46, 0.0 }
 0x3d1   : > { %1367 = vadd.xlane.f32.xlu1 %v1366_v47  ;;  %3449 = vpow2.f32 %v1344_v48 }
 0x3d2   : > { %3451 = vpow2.f32 %v1352_v53 }
 0x3d3   : > { %3453 = vpow2.f32 %v1358_v2  ;;  %v3243_v2 = vld [vmem:[%s3964_s13 + $0x28] sm:$0xff] }
 0x3d5   : > { %1146 = vrot.lane.b32.xlu0 %v4113_v57, %s3701_s18 }
 0x3d6   : > { %v3448_v50 = vpop.eup %3447 }
 0x3d7   : > { %v1378_v52 = vsel %vm1311_vm8, %v3448_v50, 0.0  ;;  %v3450_v37 = vpop.eup %3449 }
 0x3d8   : > { %1379 = vadd.xlane.f32.xlu2 %v1378_v52  ;;  %v1360_v56 = vsel %vm1311_vm8, %v3450_v37, 0.0  ;;  %v3452_v63 = vpop.eup %3451 }
 0x3d9   : > { %v1372_v43 = vsel %vm1311_vm8, %v3452_v63, 0.0  ;;  %v3454_v3 = vpop.eup %3453 }
 0x3da   : > { %v1381_v4 = vsel %vm1311_vm8, %v3454_v3, 0.0 }
 0x3de   : > { %v3415_v54 = vpop.permute.xlu0 %3414 }
 0x3df   : > { %v3417_v58 = vunpack.i.h.bf16 %v3415_v54  ;;  %v3416_v59 = vunpack.i.l.bf16 %v3415_v54 }
 0x3e0   : > { %1361 = vadd.xlane.f32.xlu2 %v1360_v56 }
 0x3e1   : > { %v1156_v60 = vpack.c.bf16 %v3417_v58, %v3417_v58  ;;  %v1152_v61 = vpack.c.bf16 %v3416_v59, %v3416_v59 }
 0x3e3   : > { %v1451_v57 = vsel %vm1411_vm9, %v1152_v61, 0  ;;  %v1527_v62 = vsel %vm1411_vm9, %v1156_v60, 0 }
 0x3e4   : > { %1460 = vmatpush.bf16.msra.mxu3 %v1451_v57 }
 0x3e8   : > { %1536 = vmatpush.bf16.msrb.mxu3 %v1527_v62  ;;  %1373 = vadd.xlane.f32.xlu2 %v1372_v43  ;;  %v3245_v43 = vld [vmem:[%s3964_s13 + $0x38] sm:$0xff] }
 0x3ea   : > { %1144 = vrot.lane.b32.xlu1 %v4111_v55, %s3701_s18 }
 0x414   : > { %1382 = vadd.xlane.f32.xlu1 %v1381_v4  ;;  %v3241_v4 = vld [vmem:[%s3964_s13 + $0x18] sm:$0xff] }
 0x42b   : > { %v1365_v5 = vpop.xlane.xlu0 %1364 }
 0x42c   : > { %3455 = vrcp.f32 %v1365_v5  ;;  %v1371_v10 = vpop.xlane.xlu1 %1370  ;;  %v3240_v5 = vld [vmem:[%s3964_s13 + $0x10] sm:$0xff] }
 0x432   : > { %v3456_v6 = vpop.eup %3455 }
 0x433   : > { %v1393_v7 = vmul.f32 %v3456_v6, %v4134_v20  ;;  %v3239_v6 = vld [vmem:[%s3964_s13 + $0x8] sm:$0xff] }
 0x434   : > { %v1377_v9 = vpop.xlane.xlu0 %1376 }
 0x435   : > { %v1401_v8 = vpack.c.bf16 %v1393_v7, %v1393_v7  ;;  %3457 = vrcp.f32 %v1377_v9  ;;  %v3238_v7 = vld [vmem:[%s3964_s13] sm:$0xff] }
 0x437   : > { %2879 = vmatmul.msk.bf16.vlgmr.msrb.gmra.mxu2 %vm1311_vm8, %v1401_v8 }
 0x43b   : > { %v3458_v55 = vpop.eup %3457 }
 0x43c   : > { %v1397_v1 = vmul.f32 %v3458_v55, %v4142_v29 }
 0x43e   : > { %v1405_v12 = vpack.c.bf16 %v1397_v1, %v1397_v1 }
 0x444   : > { %v1368_v11 = vpop.xlane.xlu1 %1367 }
 0x445   : > { %3459 = vrcp.f32 %v1368_v11 }
 0x447   : > { %2883 = vmatmul.msk.bf16.vlgmr.msra.gmra.mxu2 %vm1311_vm8, %v1405_v12  ;;  %v1147_v20 = vpop.permute.xlu0 %1146 }
 0x448   : > { %v1157_v25 = vpack.c.bf16 %v1147_v20, %v1147_v20 }
 0x44a   : > { %v1546_v33 = vsel %vm1411_vm9, %v1157_v25, 0 }
 0x44b   : > { %v3460_v13 = vpop.eup %3459  ;;  %v1380_v14 = vpop.xlane.xlu2 %1379 }
 0x44c   : > { %v1394_v15 = vmul.f32 %v3460_v13, %v3446_v46  ;;  %3461 = vrcp.f32 %v1380_v14 }
 0x44d   : > { %3463 = vrcp.f32 %v1371_v10 }
 0x44e   : > { %v1402_v16 = vpack.c.bf16 %v1394_v15, %v1394_v15 }
 0x450   : > { %2880 = vmatmul.msk.bf16.vlgmr.msra.gmra.mxu3 %vm1311_vm8, %v1402_v16 }
 0x452   : > { %v3462_v18 = vpop.eup %3461 }
 0x453   : > { %v1362_v17 = vpop.xlane.xlu2 %1361  ;;  %v3464_v19 = vpop.eup %3463  ;;  %v1398_v23 = vmul.f32 %v3462_v18, %v3448_v50 }
 0x454   : > { %3465 = vrcp.f32 %v1362_v17  ;;  %v1395_v27 = vmul.f32 %v3464_v19, %v4136_v21 }
 0x455   : > { %v1406_v31 = vpack.c.bf16 %v1398_v23, %v1398_v23  ;;  %v3433_v23 = vld [vmem:[%s4467_s8] ss:$0 sm:$0xff] }
 0x456   : > { %v1403_v34 = vpack.c.bf16 %v1395_v27, %v1395_v27 }
 0x45a   : > { %v3466_v22 = vpop.eup %3465 }
 0x45b   : > { %v1392_v24 = vmul.f32 %v3466_v22, %v3450_v37  ;;  %v1374_v28 = vpop.xlane.xlu2 %1373 }
 0x45c   : > { %v1145_v26 = vpop.permute.xlu1 %1144  ;;  %3467 = vrcp.f32 %v1374_v28 }
 0x45d   : > { %v1153_v29 = vpack.c.bf16 %v1145_v26, %v1145_v26  ;;  %v1400_v30 = vpack.c.bf16 %v1392_v24, %v1392_v24 }
 0x45f   : > { %v1470_v32 = vsel %vm1411_vm9, %v1153_v29, 0  ;;  %2878 = vmatmul.msk.bf16.vlgmr.msrb.gmra.mxu1 %vm1311_vm8, %v1400_v30  ;;  %v3704_v30 = vmov 128.0  }
 0x460   : > { %1479 = vmatpush.bf16.msrb.mxu0 %v1470_v32  ;;  %2884 = vmatmul.msk.bf16.vlgmr.msrb.gmra.mxu3 %vm1311_vm8, %v1406_v31 }
 0x461   : > { %1662 = vmatpush.bf16.msrb.mxu1 %v3245_v43  ;;  %v3273_v43 = vld [vmem:[%s3943_s16 + $0xd4] sm:$0xf0] }
 0x462   : > { %v3468_v35 = vpop.eup %3467 }
 0x463   : > { %2881 = vmatmul.msk.bf16.vlgmr.msrb.gmra.mxu0 %vm1311_vm8, %v1403_v34  ;;  %v1396_v21 = vmul.f32 %v3468_v35, %v3452_v63 }
 0x464   : > { %1555 = vmatpush.bf16.msra.mxu0 %v1546_v33 }
 0x465   : > { %v1404_v36 = vpack.c.bf16 %v1396_v21, %v1396_v21  ;;  %1663 = vmatpush.bf16.msrb.mxu1 %v3244_v0 }
 0x469   : > { %1664 = vmatpush.bf16.msrb.mxu1 %v3243_v2 }
 0x46f   : > { %2882 = vmatmul.msk.bf16.vlgmr.msra.gmra.mxu1 %vm1311_vm8, %v1404_v36 }
 0x487   : > { %v1383_v38 = vpop.xlane.xlu1 %1382 }
 0x488   : > { %3469 = vrcp.f32 %v1383_v38 }
 0x489   : > { %3471 = vrcp.f32 %v3704_v30  ;;  %v3260_v30 = vld [vmem:[%s3943_s16 + $0x6c] sm:$0xf0] }
 0x48e   : > { %v3470_v39 = vpop.eup %3469 }
 0x48f   : > { %v1399_v40 = vmul.f32 %v3470_v39, %v3454_v3  ;;  %v3242_v3 = vld [vmem:[%s3964_s13 + $0x20] sm:$0xff]  ;;  %v3472_v31 = vpop.eup %3471 }
 0x490   : > { %1665 = vmatpush.bf16.msrb.mxu1 %v3242_v3  ;;  %v1685_v32 = vmul.f32 128.0, %v3472_v31  ;;  %vm1689_vm12 = vweird.f32 %v3472_v31  ;;  %v3271_v3 = vld [vmem:[%s3943_s16 + $0xcc] sm:$0xf] }
 0x491   : > { %v1407_v42 = vpack.c.bf16 %v1399_v40, %v1399_v40 }
 0x492   : > { %v1686_v33 = vsub.f32 1.0, %v1685_v32 }
 0x493   : > { %2885 = vmatmul.msk.bf16.vlgmr.msra.gmra.mxu0 %vm1311_vm8, %v1407_v42 }
 0x494   : > { %1666 = vmatpush.bf16.msrb.mxu1 %v3241_v4  ;;  %v1687_v34 = vmul.f32 %v3472_v31, %v1686_v33  ;;  %v3026_v4 = vld [vmem:[%s3943_s16 + $0xd8] sm:$0xf0]  ;;  %v2970_v33 = vld [vmem:[%s3943_s16 + $0x70] sm:$0xf0] }
 0x496   : > { %v1688_v35 = vadd.f32 %v3472_v31, %v1687_v34  ;;  %v2976_v34 = vld [vmem:[%s3943_s16 + $0x68] sm:$0xf] }
 0x498   : > { %1667 = vmatpush.bf16.msrb.mxu1 %v3240_v5  ;;  %v4195_v21 = vsel %vm1689_vm12, %v3472_v31, %v1688_v35  ;;  %v3029_v5 = vor.u32 %v3271_v3, %v3026_v4  ;;  %v3258_v31 = vld [vmem:[%s3943_s16 + $0x64] sm:$0xf]  ;;  %v3261_v35 = vld [vmem:[%s3943_s16 + $0x74] sm:$0xf0]  ;;  %v3251_v3 = vld [vmem:[%s3943_s16 + $0x2c] sm:$0xf] }
 0x499   : > { %v2946_v4 = vld [vmem:[%s3943_s16 + $0x38] sm:$0xf0] }
 0x49c   : > { %1668 = vmatpush.bf16.msrb.mxu1 %v3239_v6  ;;  %v3000_v6 = vld [vmem:[%s3943_s16 + $0xa0] sm:$0xf] }
 0x4a0   : > { %1669 = vmatpush.bf16.msrb.mxu1 %v3238_v7  ;;  %v3268_v7 = vld [vmem:[%s3943_s16 + $0xac] sm:$0xf0] }
 0x4ba   : > { %v1443_v45 = vpop.f32.mrf.mxu2 }
 0x4c2   : > { %v1445_v46 = vpop.f32.mrf.mxu2 }
 0x4c3   : > { %v3032_v46 = vld [vmem:[%s3943_s16 + $0xe0] sm:$0xf] }
 0x4ca   : > { %v1519_v47 = vpop.f32.mrf.mxu2 }
 0x4cb   : > { %v3418_v48 = vpack.i.bf16 %v1519_v47, %v1443_v45  ;;  %v3276_v47 = vld [vmem:[%s3943_s16 + $0xec] sm:$0xf0] }
 0x4cd   : > { %3419 = vrot.lane.b32.xlu2 %v3418_v48, %s3701_s18  ;;  %v3274_v48 = vld [vmem:[%s3943_s16 + $0xe4] sm:$0xf] }
 0x4d2   : > { %v1521_v49 = vpop.f32.mrf.mxu2 }
 0x4d3   : > { %v1462_v50 = vpop.f32.mrf.mxu3  ;;  %v3033_v49 = vor.u32 %v3276_v47, %v3032_v46  ;;  %v3256_v46 = vld [vmem:[%s3943_s16 + $0x4c] sm:$0xf0]  ;;  %v3254_v47 = vld [vmem:[%s3943_s16 + $0x44] sm:$0xf] }
 0x4d5   : > { %1940 = vmatpush.bf16.msrb.mxu2 %v3033_v49  ;;  %v2954_v49 = vld [vmem:[%s3943_s16 + $0x50] sm:$0xf0] }
 0x4db   : > { %v1464_v51 = vpop.f32.mrf.mxu3 }
 0x4dc   : > { %v1424_v52 = vpop.f32.mrf.mxu1  ;;  %v3040_v51 = vld [vmem:[%s3943_s16 + $0xe8] sm:$0xf] }
 0x4e0   : > { %v1481_v53 = vpop.f32.mrf.mxu0 }
 0x4e3   : > { %v1538_v37 = vpop.f32.mrf.mxu3 }
 0x4e4   : > { %v1426_v54 = vpop.f32.mrf.mxu1  ;;  %v3423_v58 = vpack.i.bf16 %v1538_v37, %v1462_v50  ;;  %v3034_v50 = vld [vmem:[%s3943_s16 + $0xf0] sm:$0xf0] }
 0x4e5   : > { %v3275_v54 = vld [vmem:[%s3943_s16 + $0xec] sm:$0xf] }
 0x4e6   : > { %3424 = vrot.lane.b32.xlu0 %v3423_v58, %s3702_s2  ;;  %v3042_v58 = vld [vmem:[%s3943_s16 + $0xf8] sm:$0xf0] }
 0x4e8   : > { %v1483_v59 = vpop.f32.mrf.mxu0 }
 0x4e9   : > { %v3045_v59 = vor.u32 %v3275_v54, %v3042_v58  ;;  %v2962_v54 = vld [vmem:[%s3943_s16 + $0x58] sm:$0xf0] }
 0x4eb   : > { %v1540_v56 = vpop.f32.mrf.mxu3  ;;  %1982 = vmatpush.bf16.msra.mxu1 %v3045_v59  ;;  %v2936_v59 = vld [vmem:[%s3943_s16 + $0x20] sm:$0xf] }
 0x4ec   : > { %v1500_v60 = vpop.f32.mrf.mxu1  ;;  %v3016_v56 = vld [vmem:[%s3943_s16 + $0xc0] sm:$0xf] }
 0x4ef   : > { %1983 = vmatpush.bf16.msra.mxu1 %v3029_v5  ;;  %v2920_v5 = vld [vmem:[%s3943_s16] sm:$0xf] }
 0x4f4   : > { %v1502_v61 = vpop.f32.mrf.mxu1 }
 0x4f5   : > { %v3270_v61 = vld [vmem:[%s3943_s16 + $0xc4] sm:$0xf] }
 0x510   : > { %v1557_v57 = vpop.f32.mrf.mxu0 }
 0x511   : > { %v3428_v62 = vpack.i.bf16 %v1557_v57, %v1481_v53  ;;  %v3037_v53 = vor.u32 %v3274_v48, %v3034_v50  ;;  %v2960_v50 = vld [vmem:[%s3943_s16 + $0x48] sm:$0xf] }
 0x513   : > { %3429 = vrot.lane.b32.xlu1 %v3428_v62, %s3703_s22  ;;  %1954 = vmatpush.bf16.msra.mxu3 %v3037_v53  ;;  %v3018_v62 = vld [vmem:[%s3943_s16 + $0xd0] sm:$0xf0] }
 0x514   : > { %v3021_v0 = vor.u32 %v3270_v61, %v3018_v62  ;;  %v2944_v62 = vld [vmem:[%s3943_s16 + $0x28] sm:$0xf] }
 0x517   : > { %1955 = vmatpush.bf16.msra.mxu3 %v3021_v0 }
 0x518   : > { %v1559_v63 = vpop.f32.mrf.mxu0 }
 0x519   : > { %v3024_v63 = vld [vmem:[%s3943_s16 + $0xc8] sm:$0xf] }
 0x51a   : > { %v3025_v2 = vor.u32 %v3273_v43, %v3024_v63  ;;  %v3253_v63 = vld [vmem:[%s3943_s16 + $0x34] sm:$0xf0] }
 0x527   : > { %v3420_v8 = vpop.permute.xlu2 %3419 }
 0x528   : > { %v3422_v10 = vunpack.i.h.bf16 %v3420_v8  ;;  %v3421_v55 = vunpack.i.l.bf16 %v3420_v8  ;;  %v3266_v8 = vld [vmem:[%s3943_s16 + $0xa4] sm:$0xf] }
 0x52a   : > { %v1586_v13 = vsel %vm1158_vm7, %v1500_v60, %v3422_v10  ;;  %v1585_v14 = vsel %vm1158_vm7, %v1424_v52, %v3421_v55  ;;  %v3277_v52 = vld [vmem:[%s3943_s16 + $0xf4] sm:$0xf0]  ;;  %v3272_v60 = vld [vmem:[%s3943_s16 + $0xcc] sm:$0xf0]  ;;  %v3002_v10 = vld [vmem:[%s3943_s16 + $0xb0] sm:$0xf0] }
 0x52b   : > { %v3041_v37 = vor.u32 %v3277_v52, %v3040_v51  ;;  %v3017_v57 = vor.u32 %v3272_v60, %v3016_v56  ;;  %v3008_v55 = vld [vmem:[%s3943_s16 + $0xa8] sm:$0xf]  ;;  %v3257_v51 = vld [vmem:[%s3943_s16 + $0x54] sm:$0xf0]  ;;  %v2957_v52 = vor.u32 %v3254_v47, %v2954_v49  ;;  %v3252_v56 = vld [vmem:[%s3943_s16 + $0x2c] sm:$0xf0] }
 0x52c   : > { %v2961_v53 = vor.u32 %v3257_v51, %v2960_v50  ;;  %v3250_v60 = vld [vmem:[%s3943_s16 + $0x24] sm:$0xf]  ;;  %v2937_v61 = vor.u32 %v3252_v56, %v2936_v59  ;;  %v3300_v49 = vld [vmem:[%s3949_s30 + $0xb0] sm:$0xff]  ;;  %v3285_v51 = vld [vmem:[%s3949_s30 + $0x38] sm:$0xff] }
 0x52d   : > { %1968 = vmatpush.bf16.msrb.mxu0 %v3041_v37  ;;  %1941 = vmatpush.bf16.msrb.mxu2 %v3017_v57  ;;  %v3255_v37 = vld [vmem:[%s3943_s16 + $0x4c] sm:$0xf]  ;;  %v2938_v57 = vld [vmem:[%s3943_s16 + $0x30] sm:$0xf0]  ;;  %v3298_v59 = vld [vmem:[%s3949_s30 + $0xa0] sm:$0xff] }
 0x52e   : > { %v2965_v58 = vor.u32 %v3255_v37, %v2962_v54  ;;  %v2941_v0 = vor.u32 %v3250_v60, %v2938_v57  ;;  %v3308_v50 = vld [vmem:[%s3949_s30 + $0xf0] sm:$0xff]  ;;  %v3307_v37 = vld [vmem:[%s3949_s30 + $0xe8] sm:$0xff]  ;;  %v3306_v56 = vld [vmem:[%s3949_s30 + $0xe0] sm:$0xff] }
 0x52f   : > { %v3284_v54 = vld [vmem:[%s3949_s30 + $0x30] sm:$0xff]  ;;  %v3283_v60 = vld [vmem:[%s3949_s30 + $0x28] sm:$0xff]  ;;  %v3297_v57 = vld [vmem:[%s3949_s30 + $0x98] sm:$0xff] }
 0x531   : > { %1969 = vmatpush.bf16.msrb.mxu0 %v3025_v2  ;;  %v2945_v2 = vor.u32 %v3253_v63, %v2944_v62  ;;  %v3305_v62 = vld [vmem:[%s3949_s30 + $0xd8] sm:$0xff]  ;;  %v3282_v63 = vld [vmem:[%s3949_s30 + $0x20] sm:$0xff] }
 0x558   : > { %v3425_v9 = vpop.permute.xlu0 %3424 }
 0x559   : > { %v3427_v1 = vunpack.i.h.bf16 %v3425_v9  ;;  %v3426_v11 = vunpack.i.l.bf16 %v3425_v9  ;;  %v3001_v9 = vor.u32 %v3268_v7, %v3000_v6  ;;  %v2949_v7 = vor.u32 %v3251_v3, %v2946_v4  ;;  %v4312_v3 = vld [vmem:[%s3987_s3] sm:$0xf]  ;;  %v3281_v4 = vld [vmem:[%s3949_s30 + $0x18] sm:$0xff] }
 0x55b   : > { %v1589_v17 = vsel %vm1587_vm10, %v1586_v13, %v3427_v1  ;;  %v1588_v18 = vsel %vm1587_vm10, %v1585_v14, %v3426_v11  ;;  %v3269_v1 = vld [vmem:[%s3943_s16 + $0xb4] sm:$0xf0]  ;;  %v3005_v11 = vor.u32 %v3266_v8, %v3002_v10  ;;  %v3267_v13 = vld [vmem:[%s3943_s16 + $0xac] sm:$0xf]  ;;  %v3010_v14 = vld [vmem:[%s3943_s16 + $0xb8] sm:$0xf0]  ;;  %1942 = vmatpush.bf16.msrb.mxu2 %v3001_v9 }
 0x55c   : > { %v3248_v8 = vld [vmem:[%s3943_s16 + $0xc] sm:$0xf0]  ;;  %v3246_v9 = vld [vmem:[%s3943_s16 + $0x4] sm:$0xf]  ;;  %v2922_v10 = vld [vmem:[%s3943_s16 + $0x10] sm:$0xf0] }
 0x55d   : > { %1956 = vmatpush.bf16.msra.mxu3 %v3005_v11  ;;  %v2928_v11 = vld [vmem:[%s3943_s16 + $0x8] sm:$0xf] }
 0x585   : > { %v3430_v12 = vpop.permute.xlu1 %3429 }
 0x586   : > { %v3432_v15 = vunpack.i.h.bf16 %v3430_v12  ;;  %v3431_v16 = vunpack.i.l.bf16 %v3430_v12  ;;  %v3009_v12 = vor.u32 %v3269_v1, %v3008_v55  ;;  %v2921_v55 = vor.u32 %v3248_v8, %v2920_v5  ;;  %v3289_v5 = vld [vmem:[%s3949_s30 + $0x58] sm:$0xff] }
 0x587   : > { %v2925_v1 = vor.u32 %v3246_v9, %v2922_v10  ;;  %v1774_v8 = vperm.slane %v4312_v3, 2  ;;  %v1775_v9 = vperm.slane %v4312_v3, 3  ;;  %v3280_v10 = vld [vmem:[%s3949_s30 + $0x10] sm:$0xff] }
 0x588   : > { %v1591_v19 = vsel %vm1590_vm11, %v1588_v18, %v3431_v16  ;;  %v1592_v20 = vsel %vm1590_vm11, %v1589_v17, %v3432_v15  ;;  %v3013_v15 = vor.u32 %v3267_v13, %v3010_v14  ;;  %1970 = vmatpush.bf16.msrb.mxu0 %v3009_v12  ;;  %v2984_v16 = vld [vmem:[%s3943_s16 + $0x80] sm:$0xf]  ;;  %v3264_v17 = vld [vmem:[%s3943_s16 + $0x8c] sm:$0xf0]  ;;  %v3262_v18 = vld [vmem:[%s3943_s16 + $0x84] sm:$0xf] }
 0x589   : > { %v1593_v22 = vpack.c.bf16 %v1592_v20, %v1591_v19  ;;  %v2985_v19 = vor.u32 %v3264_v17, %v2984_v16  ;;  %v2986_v20 = vld [vmem:[%s3943_s16 + $0x90] sm:$0xf0]  ;;  %v3249_v12 = vld [vmem:[%s3943_s16 + $0x14] sm:$0xf0]  ;;  %v3247_v13 = vld [vmem:[%s3943_s16 + $0xc] sm:$0xf] }
 0x58a   : > { %1984 = vmatpush.bf16.msra.mxu1 %v3013_v15  ;;  %v2929_v15 = vor.u32 %v3249_v12, %v2928_v11  ;;  %v2930_v16 = vld [vmem:[%s3943_s16 + $0x18] sm:$0xf0]  ;;  %v3294_v12 = vld [vmem:[%s3949_s30 + $0x80] sm:$0xff] }
 0x58b   : > { %1670 = vmatmul.bf16.vlgmr.msrb.gmra.mxu1 %v1593_v22  ;;  %v2992_v22 = vld [vmem:[%s3943_s16 + $0x88] sm:$0xf]  ;;  %1943 = vmatpush.bf16.msrb.mxu2 %v2985_v19  ;;  %v2933_v17 = vor.u32 %v3247_v13, %v2930_v16  ;;  %v3302_v13 = vld [vmem:[%s3949_s30 + $0xc0] sm:$0xff]  ;;  %v1772_v16 = vperm.slane %v4312_v3, 0 }
 0x608   : > { %v1671_v24 = vpop.f32.mrf.mxu1 }
 0x609   : > { %v1672_v25 = vadd.f32 %v3433_v23, %v1671_v24  ;;  %v2989_v24 = vor.u32 %v3262_v18, %v2986_v20 }
 0x60b   : > { %v1676_v26 = vadd.f32 %v1672_v25, %v4057_v41  ;;  %1957 = vmatpush.bf16.msra.mxu3 %v2989_v24 }
 0x60d   : > { %1680 = vadd.xlane.f32.xlu0 %v1676_v26 }
 0x610   : > { %v1673_v27 = vpop.f32.mrf.mxu1 }
 0x611   : > { %v1674_v28 = vadd.f32 %v3433_v23, %v1673_v27  ;;  %v3265_v23 = vld [vmem:[%s3943_s16 + $0x94] sm:$0xf0]  ;;  %v2994_v27 = vld [vmem:[%s3943_s16 + $0x98] sm:$0xf0] }
 0x612   : > { %v2993_v25 = vor.u32 %v3265_v23, %v2992_v22 }
 0x613   : > { %v1677_v29 = vadd.f32 %v1674_v28, %v4059_v44 }
 0x614   : > { %1971 = vmatpush.bf16.msrb.mxu0 %v2993_v25 }
 0x615   : > { %1682 = vadd.xlane.f32.xlu2 %v1677_v29 }
 0x680   : > { %v1681_v41 = vpop.xlane.xlu0 %1680 }
 0x681   : > { %v1691_v44 = vmul.f32 %v4195_v21, %v1681_v41  ;;  %v2973_v41 = vor.u32 %v3258_v31, %v2970_v33 }
 0x683   : > { %v4198_v36 = vsub.f32 %v1676_v26, %v1691_v44  ;;  %v3263_v26 = vld [vmem:[%s3943_s16 + $0x8c] sm:$0xf]  ;;  %v2977_v44 = vor.u32 %v3261_v35, %v2976_v34  ;;  %1958 = vmatpush.bf16.msra.mxu3 %v2973_v41  ;;  %v3434_v35 = vld [vmem:[%s4468_s29] ss:$0 sm:$0xff] }
 0x684   : > { %v2997_v28 = vor.u32 %v3263_v26, %v2994_v27 }
 0x685   : > { %v1695_v38 = vmul.f32 %v4198_v36, %v4198_v36  ;;  %1972 = vmatpush.bf16.msrb.mxu0 %v2977_v44 }
 0x686   : > { %1985 = vmatpush.bf16.msra.mxu1 %v2997_v28 }
 0x687   : > { %1697 = vadd.xlane.f32.xlu1 %v1695_v38  ;;  %v3259_v38 = vld [vmem:[%s3943_s16 + $0x6c] sm:$0xf]  ;;  %1959 = vmatpush.bf16.msra.mxu3 %v2957_v52  ;;  %v3293_v52 = vld [vmem:[%s3949_s30 + $0x78] sm:$0xff] }
 0x688   : > { %v1683_v39 = vpop.xlane.xlu2 %1682 }
 0x689   : > { %v1692_v40 = vmul.f32 %v4195_v21, %v1683_v39  ;;  %v2978_v39 = vld [vmem:[%s3943_s16 + $0x78] sm:$0xf0]  ;;  %1973 = vmatpush.bf16.msrb.mxu0 %v2961_v53  ;;  %v3299_v53 = vld [vmem:[%s3949_s30 + $0xa8] sm:$0xff] }
 0x68b   : > { %v4203_v42 = vsub.f32 %v1677_v29, %v1692_v40  ;;  %v2968_v29 = vld [vmem:[%s3943_s16 + $0x60] sm:$0xf]  ;;  %v2981_v40 = vor.u32 %v3259_v38, %v2978_v39  ;;  %1960 = vmatpush.bf16.msra.mxu3 %v2941_v0  ;;  %v3296_v0 = vld [vmem:[%s3949_s30 + $0x90] sm:$0xff] }
 0x68c   : > { %v2969_v32 = vor.u32 %v3260_v30, %v2968_v29 }
 0x68d   : > { %v1696_v45 = vmul.f32 %v4203_v42, %v4203_v42  ;;  %1986 = vmatpush.bf16.msra.mxu1 %v2981_v40  ;;  %1974 = vmatpush.bf16.msrb.mxu0 %v2945_v2  ;;  %v3304_v2 = vld [vmem:[%s3949_s30 + $0xd0] sm:$0xff] }
 0x68e   : > { %1944 = vmatpush.bf16.msrb.mxu2 %v2969_v32 }
 0x68f   : > { %1699 = vadd.xlane.f32.xlu0 %v1696_v45  ;;  %v2952_v45 = vld [vmem:[%s3943_s16 + $0x40] sm:$0xf]  ;;  %1961 = vmatpush.bf16.msra.mxu3 %v2925_v1 }
 0x690   : > { %v2953_v48 = vor.u32 %v3256_v46, %v2952_v45 }
 0x691   : > { %1987 = vmatpush.bf16.msra.mxu1 %v2965_v58  ;;  %1975 = vmatpush.bf16.msrb.mxu0 %v2929_v15  ;;  %v3292_v58 = vld [vmem:[%s3949_s30 + $0x70] sm:$0xff] }
 0x692   : > { %1945 = vmatpush.bf16.msrb.mxu2 %v2953_v48  ;;  %v3309_v48 = vld [vmem:[%s3949_s30 + $0xf8] sm:$0xff] }
 0x693   : > { %2346 = vmatpush.bf16.msrb.mxu3 %v3293_v52 }
 0x695   : > { %1988 = vmatpush.bf16.msra.mxu1 %v2949_v7  ;;  %v3303_v7 = vld [vmem:[%s3949_s30 + $0xc8] sm:$0xff] }
 0x696   : > { %1946 = vmatpush.bf16.msrb.mxu2 %v2937_v61  ;;  %v3291_v61 = vld [vmem:[%s3949_s30 + $0x68] sm:$0xff] }
 0x697   : > { %2347 = vmatpush.bf16.msrb.mxu3 %v3292_v58 }
 0x699   : > { %1989 = vmatpush.bf16.msra.mxu1 %v2933_v17  ;;  %v1773_v17 = vperm.slane %v4312_v3, 1 }
 0x69a   : > { %1947 = vmatpush.bf16.msrb.mxu2 %v2921_v55  ;;  %v3288_v55 = vld [vmem:[%s3949_s30 + $0x50] sm:$0xff] }
 0x69b   : > { %2348 = vmatpush.bf16.msrb.mxu3 %v3291_v61 }
 0x69d   : > { %2374 = vmatpush.bf16.msrb.mxu1 %v3309_v48 }
 0x69e   : > { %2332 = vmatpush.bf16.msra.mxu2 %v3285_v51 }
 0x6a1   : > { %2375 = vmatpush.bf16.msrb.mxu1 %v3308_v50 }
 0x6a2   : > { %2333 = vmatpush.bf16.msra.mxu2 %v3284_v54 }
 0x6a5   : > { %2376 = vmatpush.bf16.msrb.mxu1 %v3307_v37 }
 0x6a6   : > { %2334 = vmatpush.bf16.msra.mxu2 %v3283_v60 }
 0x6a9   : > { %2377 = vmatpush.bf16.msrb.mxu1 %v3306_v56 }
 0x6aa   : > { %2335 = vmatpush.bf16.msra.mxu2 %v3282_v63 }
 0x6ad   : > { %2378 = vmatpush.bf16.msrb.mxu1 %v3305_v62 }
 0x6ae   : > { %2336 = vmatpush.bf16.msra.mxu2 %v3281_v4 }
 0x6b1   : > { %2379 = vmatpush.bf16.msrb.mxu1 %v3304_v2 }
 0x6b2   : > { %2337 = vmatpush.bf16.msra.mxu2 %v3280_v10 }
 0x6b5   : > { %2380 = vmatpush.bf16.msrb.mxu1 %v3303_v7 }
 0x6b9   : > { %2381 = vmatpush.bf16.msrb.mxu1 %v3302_v13 }
 0x6fa   : > { %v1698_v43 = vpop.xlane.xlu1 %1697 }
 0x6fb   : > { %v1701_v6 = vmul.f32 %v1698_v43, %v4195_v21  ;;  %v3290_v43 = vld [vmem:[%s3949_s30 + $0x60] sm:$0xff] }
 0x6fc   : > { %2349 = vmatpush.bf16.msrb.mxu3 %v3290_v43 }
 0x6fd   : > { %v1703_v14 = vadd.f32 1e-12, %v1701_v6  ;;  %v3295_v6 = vld [vmem:[%s3949_s30 + $0x88] sm:$0xff] }
 0x6ff   : > { %3473 = vrsqrt.f32 %v1703_v14  ;;  %vm1711_vm14 = vweird.f32 %v1703_v14 }
 0x700   : > { %2350 = vmatpush.bf16.msrb.mxu3 %v3289_v5 }
 0x702   : > { %v1700_v18 = vpop.xlane.xlu0 %1699 }
 0x703   : > { %v1702_v19 = vmul.f32 %v1700_v18, %v4195_v21  ;;  %v3279_v18 = vld [vmem:[%s3949_s30 + $0x8] sm:$0xff] }
 0x704   : > { %2351 = vmatpush.bf16.msrb.mxu3 %v3288_v55  ;;  %2338 = vmatpush.bf16.msra.mxu2 %v3279_v18 }
 0x705   : > { %v3474_v20 = vpop.eup %3473  ;;  %v1704_v22 = vadd.f32 1e-12, %v1702_v19  ;;  %v3287_v19 = vld [vmem:[%s3949_s30 + $0x48] sm:$0xff] }
 0x706   : > { %v1706_v23 = vmul.f32 %v3474_v20, %v1703_v14  ;;  %vm1712_vm13 = vweird.f32 %v3474_v20 }
 0x707   : > { %3475 = vrsqrt.f32 %v1704_v22  ;;  %vm1713_vm15 = vmor %vm1711_vm14, %vm1712_vm13  ;;  %vm1721_vm1 = vweird.f32 %v1704_v22 }
 0x708   : > { %v1707_v24 = vmul.f32 %v3474_v20, %v1706_v23  ;;  %2352 = vmatpush.bf16.msrb.mxu3 %v3287_v19 }
 0x70a   : > { %v1708_v25 = vmul.f32 0.5, %v1707_v24 }
 0x70c   : > { %v1709_v26 = vsub.f32 1.5, %v1708_v25 }
 0x70d   : > { %v3476_v27 = vpop.eup %3475 }
 0x70e   : > { %v1710_v28 = vmul.f32 %v3474_v20, %v1709_v26  ;;  %v1716_v29 = vmul.f32 %v3476_v27, %v1704_v22  ;;  %vm1722_vm0 = vweird.f32 %v3476_v27 }
 0x70f   : > { %vm1723_vm2 = vmor %vm1721_vm1, %vm1722_vm0 }
 0x710   : > { %v1717_v30 = vmul.f32 %v3476_v27, %v1716_v29  ;;  %v1714_v31 = vsel %vm1713_vm15, %v3474_v20, %v1710_v28  ;;  %v3278_v29 = vld [vmem:[%s3949_s30] sm:$0xff] }
 0x711   : > { %v1725_v34 = vmul.f32 %v1714_v31, %v4198_v36  ;;  %v3435_v36 = vld [vmem:[%s779_s26] ss:$0 sm:$0xff]  ;;  %2339 = vmatpush.bf16.msra.mxu2 %v3278_v29 }
 0x712   : > { %v1718_v32 = vmul.f32 0.5, %v1717_v30  ;;  %v3286_v30 = vld [vmem:[%s3949_s30 + $0x40] sm:$0xff] }
 0x713   : > { %v1730_v39 = vmul.f32 %v3434_v35, %v1725_v34  ;;  %2353 = vmatpush.bf16.msrb.mxu3 %v3286_v30 }
 0x714   : > { %v1719_v33 = vsub.f32 1.5, %v1718_v32 }
 0x715   : > { %v4285_v45 = vadd.f32 %v3435_v36, %v1730_v39 }
 0x716   : > { %v1720_v41 = vmul.f32 %v3476_v27, %v1719_v33 }
 0x718   : > { %v1724_v44 = vsel %vm1723_vm2, %v3476_v27, %v1720_v41 }
 0x719   : > { %v1726_v38 = vmul.f32 %v1724_v44, %v4203_v42  ;;  %v3301_v42 = vld [vmem:[%s3949_s30 + $0xb8] sm:$0xff] }
 0x71a   : > { %2360 = vmatpush.bf16.msra.mxu0 %v3301_v42 }
 0x71b   : > { %v1731_v40 = vmul.f32 %v3434_v35, %v1726_v38 }
 0x71d   : > { %v4287_v46 = vadd.f32 %v3435_v36, %v1731_v40 }
 0x71e   : > { %2361 = vmatpush.bf16.msra.mxu0 %v3300_v49 }
 0x71f   : > { %v1737_v47 = vpack.c.bf16 %v4287_v46, %v4285_v45 }
 0x721   : > { %1948 = vmatmul.bf16.vlgmr.msrb.gmra.mxu2 %v1737_v47  ;;  %1962 = vmatmul.bf16.vlgmr.msra.gmra.mxu3 %v1737_v47 }
 0x722   : > { %1976 = vmatmul.bf16.vlgmr.msrb.gmra.mxu0 %v1737_v47  ;;  %1990 = vmatmul.bf16.vlgmr.msra.gmra.mxu1 %v1737_v47 }
 0x723   : > { %2362 = vmatpush.bf16.msra.mxu0 %v3299_v53 }
 0x727   : > { %2363 = vmatpush.bf16.msra.mxu0 %v3298_v59 }
 0x72b   : > { %2364 = vmatpush.bf16.msra.mxu0 %v3297_v57 }
 0x72f   : > { %2365 = vmatpush.bf16.msra.mxu0 %v3296_v0 }
 0x733   : > { %2366 = vmatpush.bf16.msra.mxu0 %v3295_v6 }
 0x737   : > { %2367 = vmatpush.bf16.msra.mxu0 %v3294_v12 }
 0x79f   : > { %v1977_v1 = vpop.f32.mrf.mxu0  ;;  %v1991_v11 = vpop.f32.mrf.mxu1 }
 0x7a0   : > { %v4324_v14 = vadd.f32 %v1977_v1, %v1774_v8  ;;  %v4326_v15 = vadd.f32 %v1991_v11, %v1775_v9 }
 0x7a2   : > { %v1998_v20 = vmul.f32 %v4324_v14, %v4324_v14  ;;  %v1999_v22 = vmul.f32 %v4326_v15, %v4326_v15 }
 0x7a4   : > { %v2006_v23 = vmul.f32 %v1998_v20, %v4324_v14  ;;  %v2007_v24 = vmul.f32 %v1999_v22, %v4326_v15  ;;  %v1949_v25 = vpop.f32.mrf.mxu2  ;;  %v1963_v26 = vpop.f32.mrf.mxu3 }
 0x7a5   : > { %v4338_v27 = vadd.f32 %v1949_v25, %v1772_v16  ;;  %v4340_v28 = vadd.f32 %v1963_v26, %v1773_v17 }
 0x7a6   : > { %v2014_v31 = vmul.f32 0.044715, %v2006_v23  ;;  %v2015_v32 = vmul.f32 0.044715, %v2007_v24 }
 0x7a7   : > { %v1996_v33 = vmul.f32 %v4338_v27, %v4338_v27  ;;  %v1997_v34 = vmul.f32 %v4340_v28, %v4340_v28  ;;  %v1979_v35 = vpop.f32.mrf.mxu0  ;;  %v1993_v41 = vpop.f32.mrf.mxu1 }
 0x7a8   : > { %v2022_v44 = vadd.f32 %v2014_v31, %v4324_v14  ;;  %v2023_v38 = vadd.f32 %v2015_v32, %v4326_v15  ;;  %v1980_v39 = vadd.f32 %v1979_v35, %v1774_v8  ;;  %v4350_v36 = vadd.f32 %v1993_v41, %v1775_v9 }
 0x7a9   : > { %v2004_v40 = vmul.f32 %v1996_v33, %v4338_v27  ;;  %v2005_v47 = vmul.f32 %v1997_v34, %v4340_v28 }
 0x7aa   : > { %v2030_v42 = vmul.f32 0.7978846, %v2022_v44  ;;  %v2002_v48 = vmul.f32 %v1980_v39, %v1980_v39  ;;  %v2003_v49 = vmul.f32 %v4350_v36, %v4350_v36  ;;  %v2031_v50 = vmul.f32 0.7978846, %v2023_v38 }
 0x7ab   : > { %v2012_v51 = vmul.f32 0.044715, %v2004_v40  ;;  %v2013_v52 = vmul.f32 0.044715, %v2005_v47 }
 0x7ac   : > { %v2010_v53 = vmul.f32 %v2002_v48, %v1980_v39  ;;  %v2011_v37 = vmul.f32 %v2003_v49, %v4350_v36  ;;  %v1951_v54 = vpop.f32.mrf.mxu2  ;;  %v1965_v58 = vpop.f32.mrf.mxu3  ;;  %3477 = vtanh.f32 %v2030_v42 }
 0x7ad   : > { %v2020_v59 = vadd.f32 %v2012_v51, %v4338_v27  ;;  %v2021_v56 = vadd.f32 %v2013_v52, %v4340_v28  ;;  %v1952_v60 = vadd.f32 %v1951_v54, %v1772_v16  ;;  %v1966_v62 = vadd.f32 %v1965_v58, %v1773_v17 }
 0x7ae   : > { %v2018_v61 = vmul.f32 0.044715, %v2010_v53  ;;  %v2019_v57 = vmul.f32 0.044715, %v2011_v37  ;;  %3479 = vtanh.f32 %v2031_v50 }
 0x7af   : > { %v2028_v63 = vmul.f32 0.7978846, %v2020_v59  ;;  %v2029_v43 = vmul.f32 0.7978846, %v2021_v56  ;;  %v2000_v0 = vmul.f32 %v1952_v60, %v1952_v60  ;;  %v2001_v4 = vmul.f32 %v1966_v62, %v1966_v62 }
 0x7b0   : > { %v2026_v2 = vadd.f32 %v2018_v61, %v1980_v39  ;;  %v2027_v3 = vadd.f32 %v2019_v57, %v4350_v36 }
 0x7b1   : > { %v2008_v5 = vmul.f32 %v2000_v0, %v1952_v60  ;;  %3481 = vtanh.f32 %v2028_v63  ;;  %v2009_v8 = vmul.f32 %v2001_v4, %v1966_v62 }
 0x7b2   : > { %v2034_v6 = vmul.f32 0.7978846, %v2026_v2  ;;  %v2035_v7 = vmul.f32 0.7978846, %v2027_v3  ;;  %3483 = vtanh.f32 %v2029_v43  ;;  %v3478_v10 = vpop.eup %3477 }
 0x7b3   : > { %v2016_v9 = vmul.f32 0.044715, %v2008_v5  ;;  %v2017_v55 = vmul.f32 0.044715, %v2009_v8  ;;  %v2046_v13 = vadd.f32 1.0, %v3478_v10 }
 0x7b4   : > { %3485 = vtanh.f32 %v2034_v6  ;;  %v3480_v1 = vpop.eup %3479 }
 0x7b5   : > { %3487 = vtanh.f32 %v2035_v7  ;;  %v2024_v11 = vadd.f32 %v2016_v9, %v1952_v60  ;;  %v2025_v12 = vadd.f32 %v2017_v55, %v1966_v62  ;;  %v2047_v18 = vadd.f32 1.0, %v3480_v1 }
 0x7b6   : > { %v2054_v24 = vmul.f32 0.5, %v2046_v13 }
 0x7b7   : > { %v2032_v16 = vmul.f32 0.7978846, %v2024_v11  ;;  %v3482_v17 = vpop.eup %3481  ;;  %v2033_v19 = vmul.f32 0.7978846, %v2025_v12  ;;  %v2055_v26 = vmul.f32 0.5, %v2047_v18 }
 0x7b8   : > { %v3484_v20 = vpop.eup %3483  ;;  %v2044_v29 = vadd.f32 1.0, %v3482_v17  ;;  %v2062_v35 = vmul.f32 %v2054_v24, %v4324_v14 }
 0x7b9   : > { %3489 = vtanh.f32 %v2032_v16  ;;  %v2045_v31 = vadd.f32 1.0, %v3484_v20  ;;  %v2063_v38 = vmul.f32 %v2055_v26, %v4326_v15 }
 0x7ba   : > { %v3486_v22 = vpop.eup %3485  ;;  %3491 = vtanh.f32 %v2033_v19  ;;  %v2052_v40 = vmul.f32 0.5, %v2044_v29 }
 0x7bb   : > { %v3488_v23 = vpop.eup %3487  ;;  %v2050_v25 = vadd.f32 1.0, %v3486_v22  ;;  %v2053_v48 = vmul.f32 0.5, %v2045_v31 }
 0x7bc   : > { %v2051_v30 = vadd.f32 1.0, %v3488_v23  ;;  %v2060_v37 = vmul.f32 %v2052_v40, %v4338_v27 }
 0x7bd   : > { %v2058_v32 = vmul.f32 0.5, %v2050_v25  ;;  %v2061_v14 = vmul.f32 %v2053_v48, %v4340_v28 }
 0x7be   : > { %v2059_v33 = vmul.f32 0.5, %v2051_v30 }
 0x7bf   : > { %v3490_v34 = vpop.eup %3489  ;;  %v2066_v41 = vmul.f32 %v2058_v32, %v1980_v39  ;;  %v3437_v32 = vld [vmem:[%s789_s5] ss:$0 sm:$0xff] }
 0x7c0   : > { %v3492_v44 = vpop.eup %3491  ;;  %v2067_v47 = vmul.f32 %v2059_v33, %v4350_v36  ;;  %v2048_v42 = vadd.f32 1.0, %v3490_v34  ;;  %v3436_v36 = vld [vmem:[%s786_s10] ss:$0 sm:$0xff] }
 0x7c1   : > { %v2049_v49 = vadd.f32 1.0, %v3492_v44  ;;  %v2070_v50 = vpack.c.bf16 %v2066_v41, %v2062_v35  ;;  %v3438_v34 = vld [vmem:[%s792_s11] ss:$0 sm:$0xff] }
 0x7c2   : > { %v2056_v51 = vmul.f32 0.5, %v2048_v42  ;;  %v2071_v52 = vpack.c.bf16 %v2067_v47, %v2063_v38 }
 0x7c3   : > { %v2057_v53 = vmul.f32 0.5, %v2049_v49  ;;  %2368 = vmatmul.bf16.vlgmr.msra.gmra.mxu0 %v2070_v50 }
 0x7c4   : > { %v2064_v54 = vmul.f32 %v2056_v51, %v1952_v60  ;;  %2382 = vmatmul.bf16.vlgmr.msrb.gmra.mxu1 %v2071_v52 }
 0x7c5   : > { %v2065_v39 = vmul.f32 %v2057_v53, %v1966_v62 }
 0x7c6   : > { %v2068_v15 = vpack.c.bf16 %v2064_v54, %v2060_v37 }
 0x7c7   : > { %v2069_v58 = vpack.c.bf16 %v2065_v39, %v2061_v14 }
 0x7c8   : > { %2340 = vmatmul.bf16.vlgmr.msra.gmra.mxu2 %v2068_v15 }
 0x7c9   : > { %2354 = vmatmul.bf16.vlgmr.msrb.gmra.mxu3 %v2069_v58 }
 0x840   : > { %v2369_v57 = vpop.f32.mrf.mxu0 }
 0x841   : > { %v2383_v27 = vpop.f32.mrf.mxu1 }
 0x848   : > { %v2371_v4 = vpop.f32.mrf.mxu0 }
 0x849   : > { %v2385_v6 = vpop.f32.mrf.mxu1 }
 0x84b   : > { %v2341_v59 = vpop.f32.mrf.mxu2 }
 0x84c   : > { %v2342_v56 = vadd.f32 %v3436_v36, %v2341_v59  ;;  %v2355_v61 = vpop.f32.mrf.mxu3 }
 0x84e   : > { %v2356_v63 = vadd.f32 %v2355_v61, %v2342_v56 }
 0x850   : > { %v2370_v60 = vadd.f32 %v2369_v57, %v2356_v63 }
 0x852   : > { %v2384_v43 = vadd.f32 %v2383_v27, %v2370_v60 }
 0x853   : > { %v2343_v0 = vpop.f32.mrf.mxu2 }
 0x854   : > { %v2344_v28 = vadd.f32 %v3436_v36, %v2343_v0  ;;  %v2388_v62 = vadd.f32 %v2384_v43, %v4285_v45  ;;  %v2357_v2 = vpop.f32.mrf.mxu3 }
 0x856   : > { %v2358_v3 = vadd.f32 %v2357_v2, %v2344_v28  ;;  %2392 = vadd.xlane.f32.xlu0 %v2388_v62 }
 0x858   : > { %v2372_v5 = vadd.f32 %v2371_v4, %v2358_v3 }
 0x85a   : > { %v2386_v7 = vadd.f32 %v2385_v6, %v2372_v5 }
 0x85c   : > { %v2389_v8 = vadd.f32 %v2386_v7, %v4287_v46 }
 0x85e   : > { %2394 = vadd.xlane.f32.xlu2 %v2389_v8 }
 0x8c9   : > { %v2393_v9 = vpop.xlane.xlu0 %2392 }
 0x8ca   : > { %v2396_v10 = vmul.f32 %v2393_v9, %v4195_v21 }
 0x8cc   : > { %v2398_v55 = vsub.f32 %v2388_v62, %v2396_v10 }
 0x8ce   : > { %v2400_v1 = vmul.f32 %v2398_v55, %v2398_v55 }
 0x8d0   : > { %2402 = vadd.xlane.f32.xlu0 %v2400_v1 }
 0x8d1   : > { %v2395_v11 = vpop.xlane.xlu2 %2394 }
 0x8d2   : > { %v2397_v12 = vmul.f32 %v2395_v11, %v4195_v21 }
 0x8d4   : > { %v2399_v45 = vsub.f32 %v2389_v8, %v2397_v12 }
 0x8d6   : > { %v2401_v13 = vmul.f32 %v2399_v45, %v2399_v45 }
 0x8d8   : > { %2404 = vadd.xlane.f32.xlu1 %v2401_v13 }
 0x943   : > { %v2403_v16 = vpop.xlane.xlu0 %2402 }
 0x944   : > { %v2406_v17 = vmul.f32 %v2403_v16, %v4195_v21 }
 0x946   : > { %v2408_v18 = vadd.f32 1e-12, %v2406_v17 }
 0x948   : > { %3493 = vrsqrt.f32 %v2408_v18  ;;  %vm2416_vm4 = vweird.f32 %v2408_v18 }
 0x94b   : > { %v2405_v46 = vpop.xlane.xlu1 %2404 }
 0x94c   : > { %v2407_v19 = vmul.f32 %v2405_v46, %v4195_v21 }
 0x94e   : > { %v3494_v20 = vpop.eup %3493  ;;  %v2409_v22 = vadd.f32 1e-12, %v2407_v19 }
 0x94f   : > { %v2411_v23 = vmul.f32 %v3494_v20, %v2408_v18  ;;  %vm2417_vm3 = vweird.f32 %v3494_v20 }
 0x950   : > { %3495 = vrsqrt.f32 %v2409_v22  ;;  %vm2418_vm5 = vmor %vm2416_vm4, %vm2417_vm3  ;;  %vm2426_vm7 = vweird.f32 %v2409_v22 }
 0x951   : > { %v2412_v24 = vmul.f32 %v3494_v20, %v2411_v23 }
 0x953   : > { %v2413_v25 = vmul.f32 0.5, %v2412_v24 }
 0x955   : > { %v2414_v26 = vsub.f32 1.5, %v2413_v25 }
 0x956   : > { %v3496_v29 = vpop.eup %3495 }
 0x957   : > { %v2415_v30 = vmul.f32 %v3494_v20, %v2414_v26  ;;  %v2421_v31 = vmul.f32 %v3496_v29, %v2409_v22  ;;  %vm2427_vm6 = vweird.f32 %v3496_v29 }
 0x958   : > { %vm2428_vm8 = vmor %vm2426_vm7, %vm2427_vm6 }
 0x959   : > { %v2419_v21 = vsel %vm2418_vm5, %v3494_v20, %v2415_v30  ;;  %v2422_v33 = vmul.f32 %v3496_v29, %v2421_v31 }
 0x95a   : > { %v2430_v35 = vmul.f32 %v2419_v21, %v2398_v55 }
 0x95b   : > { %v2423_v41 = vmul.f32 0.5, %v2422_v33 }
 0x95c   : > { %v2435_v44 = vmul.f32 %v3437_v32, %v2430_v35 }
 0x95d   : > { %v2424_v38 = vsub.f32 1.5, %v2423_v41 }
 0x95e   : > { %v2440_v40 = vadd.f32 %v3438_v34, %v2435_v44 }
 0x95f   : > { %v2425_v47 = vmul.f32 %v3496_v29, %v2424_v38 }
 0x960   : > { %2442 = vst [vmem:[#allocation2] sm:$0xff] %v2440_v40 }
 0x961   : > { %v2429_v42 = vsel %vm2428_vm8, %v3496_v29, %v2425_v47 }
 0x962   : > { %v2431_v48 = vmul.f32 %v2429_v42, %v2399_v45 }
 0x964   : > { %v2436_v49 = vmul.f32 %v3437_v32, %v2431_v48  ;;  %2447 = sbr.rel (%p3174_p7) target bundleno = 2575 (0xa0f), region = 112 }
 0x966   : > { %v2441_v50 = vadd.f32 %v3438_v34, %v2436_v49 }
 0x968   : > { %2443 = vst [vmem:[#allocation2 + $0x8] sm:$0xff] %v2441_v50 }
 0x969   : > { %v3317_v51 = vld [vmem:[#allocation9 + $0x38] sm:$0xff]  ;;  %v2448_v52 = vrot.slane %v2440_v40, 4  ;;  %v2454_v53 = vrot.slane %v2441_v50, 4  ;;  %v3316_v37 = vld [vmem:[#allocation9 + $0x30] sm:$0xff]  ;;  %v3315_v58 = vld [vmem:[#allocation9 + $0x28] sm:$0xff]  ;;  %vm2487_vm9 = vcmask 1041409  }
 0x96a   : > { %2539 = vmatpush.bf16.msra.mxu0 %v3317_v51  ;;  %v3314_v56 = vld [vmem:[#allocation9 + $0x20] sm:$0xff]  ;;  %v3313_v63 = vld [vmem:[#allocation9 + $0x18] sm:$0xff]  ;;  %v3312_v43 = vld [vmem:[#allocation9 + $0x10] sm:$0xff] }
 0x96b   : > { %v2449_v54 = vadd.f32 %v2448_v52, %v2440_v40  ;;  %v2455_v14 = vadd.f32 %v2454_v53, %v2441_v50  ;;  %v3311_v62 = vld [vmem:[#allocation9 + $0x8] sm:$0xff]  ;;  %v3310_v4 = vld [vmem:[#allocation9] sm:$0xff]  ;;  %v2478_v7 = vld [vmem:[%s4473_s19] sm:$0x1] }
 0x96c   : > { %v2479_v8 = vmul.f32 8.0, %v2478_v7 }
 0x96d   : > { %v2450_v39 = vrot.slane %v2449_v54, 2  ;;  %v2456_v15 = vrot.slane %v2455_v14, 2 }
 0x96e   : > { %2540 = vmatpush.bf16.msra.mxu0 %v3316_v37  ;;  %v2481_v9 = vperm.slane %v2479_v8, 0 }
 0x96f   : > { %v2451_v36 = vadd.f32 %v2450_v39, %v2449_v54  ;;  %v2457_v59 = vadd.f32 %v2456_v15, %v2455_v14 }
 0x971   : > { %v2452_v61 = vrot.slane %v2451_v36, 1  ;;  %v2458_v57 = vrot.slane %v2457_v59, 1 }
 0x972   : > { %2541 = vmatpush.bf16.msra.mxu0 %v3315_v58 }
 0x973   : > { %v2453_v27 = vadd.f32 %v2452_v61, %v2451_v36  ;;  %v2459_v60 = vadd.f32 %v2458_v57, %v2457_v59 }
 0x975   : > { %v2460_v0 = vpack.c.bf16 %v2453_v27, %v2453_v27  ;;  %v2461_v28 = vpack.c.bf16 %v2459_v60, %v2459_v60 }
 0x976   : > { %2542 = vmatpush.bf16.msra.mxu0 %v3314_v56 }
 0x977   : > { %v2485_v2 = vunpack.c.l.b16 %v2460_v0  ;;  %v2486_v3 = vunpack.c.l.b16 %v2461_v28 }
 0x979   : > { %v2488_v5 = vsel %vm2487_vm9, %v2486_v3, %v2485_v2 }
 0x97a   : > { %2543 = vmatpush.bf16.msra.mxu0 %v3313_v63  ;;  %v2489_v6 = vpack.c.b16 %v2488_v5, %v2488_v5 }
 0x97e   : > { %2544 = vmatpush.bf16.msra.mxu0 %v3312_v43 }
 0x982   : > { %2545 = vmatpush.bf16.msra.mxu0 %v3311_v62 }
 0x986   : > { %2546 = vmatpush.bf16.msra.mxu0 %v3310_v4 }
 0x989   : > { %2547 = vmatmul.bf16.vlgmr.msra.gmra.mxu0 %v2489_v6 }
 0xa06   : > { %v2548_v10 = vpop.f32.mrf.mxu0 }
 0xa07   : > { %v2549_v55 = vadd.f32 %v2548_v10, %v2481_v9 }
 0xa09   : > { %2552 = vst [vmem:[#allocation11] sm:$0x3] %v2549_v55 }
 0xa0e   : > { %v2550_v1 = vpop.f32.mrf.mxu0 }
 0xa0f PF: > { %p3353_p0 = scmp.eq.s32.totalorder %s3870_s9, 1  ;;  %s3705_s17 = smov [#allocation11]  }
 0xa10   : > { %s2559_s15 = sshll.u32 %s3705_s17, 4  ;;  %s4474_s22 = sld [smem:[#allocation34_spill]]  ;;  %s2560_s15 = int_to_ptr.vmem [resolvable:$true] %s2559_s15 }
 0xa16   : > { %s2561_s13 = sshll.u32 %s4474_s22, 4  ;;  %s2562_s13 = int_to_ptr.hbm [resolvable:$true] %s2561_s13 }
 0xa17   : > { %3333 = dma.vmem_to_hbm [thread:$0]  (%p3353_p0), %s2560_s15, 32, %s2562_s13, [#allocation5]  }
 0xa18   : > { %3674 = dma.done.wait (%p3353_p0), [#allocation5], 32  }
 0xa19   : > { %3676 = vsyncadd (%p3353_p0), [#allocation5], 4294967264 }
 0xa1a PF: > { %s4475_s27 = sld [smem:[#allocation17_spill]]  ;;  %s4478_s24 = smov %s3683_s25 }
 0xa1b   : > { %s4476_s21 = sld [smem:[#allocation16_spill]] }
 0xa1c   : > { %s4477_s26 = sld [smem:[#allocation18_spill]] }
 0xa20   : > { %p32_p4 = scmp.ge.s32.totalorder %s4475_s27, 4  }
 0xa21   : > { %s4479_s25 = smov %s4476_s21 }
 0xa22   :  { %34 = sbr.rel (!%p32_p4) target bundleno = 24 (0x18), region = 188 }
 0xa27   :  { %2575 = vsyncpa [#allocation4], 1 }
 0xa28   :  { %2577 = vsyncpa [#allocation4 + $0x1], 1 }
 0xa29   :  { %2578 = vsyncpa [#allocation7], 1 }
 0xa2a   :  { %2580 = vsyncpa [#allocation7 + $0x1], 1 }
 0xa2b   :  { %2581 = vsyncpa [#allocation10], 1 }
 0xa2c   :  { %2582 = vsyncpa [#allocation5], 1 }
 0xa2d   :  { %2584 = vsyncpa [#allocation5 + $0x1], 1 }

</bundles_post_ra>
